<compile_context>
chip_gen: v6e
topology: v6e:2x2x1
jax: 0.10.0
libtpu: 0.0.40
codegen_flags: <defaults>
</compile_context>

<pallas_src>
import jax
import jax.numpy as jnp
from jax.experimental import pallas as pl
from jax.experimental.pallas import tpu as pltpu

# ---- small config (scaled-down but structurally identical to the module defaults) ----
B = 16
SEQ_LEN = 8            # == max_seq_len (multiple of 8 keeps in-kernel reshapes layout-free)
MODEL_DIM = 32         # model_dim
CONTEXT_DIM_IN = 32    # ctor "context_dim" arg
POS_EMB_DIM = 4
TARGET_DIM = CONTEXT_DIM_IN + MODEL_DIM                    # 64 (so view(-1, self.context_dim) works)
CONTEXT_DIM = TARGET_DIM + POS_EMB_DIM                     # 68
H1, H2 = 16, 8         # attention_hidden_units (scaled down from [80, 40])


def item2item_kernel(target_ref, seq_ref, mask_ref, qpos_ref,
                     wqt_ref, alpha_ref, w1_ref, b1_ref,
                     w2_ref, b2_ref, w3_ref, b3_ref,
                     attn_ref, rel_ref):
    TB, L, Dm = seq_ref.shape
    f32 = jnp.float32
    op_dtype = w1_ref.dtype          # matmul operand dtype (f32 or bf16)

    # --- W_q: target part on the MXU; position part (pos_emb @ Wq_pos + bq) precomputed ---
    q_t = jnp.dot(target_ref[...], wqt_ref[...], preferred_element_type=f32)      # (TB, Dm) f32
    q = q_t[:, None, :] + qpos_ref[...][None, :, :]                                # (TB, L, Dm) f32

    # PReLU(model_dim, init=0.1): per-channel slope (f32 VPU math, safe on v5e)
    alpha = alpha_ref[...]                                                         # (1, Dm) f32
    q = jnp.where(q >= 0.0, q, alpha[None, :, :] * q)

    seq = seq_ref[...]                                                             # (TB, L, Dm)
    seq_f32 = seq.astype(f32)

    # --- attention MLP: layer-1 is ONE fused matmul on [q | s | q*s] (the (q - s) branch
    #     of the original concat is folded into the weights in the wrapper) ---
    q2 = q.reshape(TB * L, Dm)                       # leading-dim merge: layout-free (L % 8 == 0)
    s2 = seq.reshape(TB * L, Dm)
    qs2 = (q * seq_f32).reshape(TB * L, Dm)
    x1 = jnp.concatenate([q2.astype(op_dtype), s2, qs2.astype(op_dtype)], axis=-1)  # (TB*L, 3*Dm)
    h1 = jax.nn.sigmoid(jnp.dot(x1, w1_ref[...], preferred_element_type=f32)
                        + b1_ref[...])                                             # (TB*L, H1) f32
    h2 = jax.nn.sigmoid(jnp.dot(h1.astype(op_dtype), w2_ref[...],
                                preferred_element_type=f32)
                        + b2_ref[...])                                             # (TB*L, H2) f32

    # --- score path stays (TB, L, 1): L on sublanes, no sublane->lane relayout ---
    h2 = h2.reshape(TB, L, -1)                                                     # (TB, L, H2)
    # final Linear(H2, 1): VPU multiply + 1-lane reduce (avoids an N=1 matmul)
    score = jnp.sum(h2 * w3_ref[...][None, :, :], axis=-1, keepdims=True) \
            + b3_ref[...]                                                          # (TB, L, 1)

    is_pad = mask_ref[...] == 0.0                                                  # (TB, L, 1)

    # masked softmax over the sequence (sublane) axis, all in f32
    neg = jnp.where(is_pad, -1e9, score)
    m = jnp.max(neg, axis=1, keepdims=True)                                        # (TB, 1, 1)
    e = jnp.exp(neg - m)
    p = e * pl.reciprocal(jnp.sum(e, axis=1, keepdims=True), approx=True)          # (TB, L, 1)

    # attention-weighted sum: VPU broadcast-multiply + XLU sublane reduce (no MXU micro-matmuls)
    attn_ref[...] = jnp.sum(p * seq_f32, axis=1).astype(attn_ref.dtype)            # (TB, Dm)

    # rel_i2i: sum of un-softmaxed scores with masked positions zeroed
    rel_ref[...] = jnp.sum(jnp.where(is_pad, 0.0, score), axis=1).astype(rel_ref.dtype)  # (TB, 1)


def _round_up(x, m):
    return (x + m - 1) // m * m


def item2item_forward(target_emb, sequence_emb, mask, params, *,
                      compute_dtype=jnp.float32, block_b=None):
    B_, L_, Dm_ = sequence_emb.shape
    Dt = target_emb.shape[-1]
    H1_ = params["w1"].shape[-1]
    H2_ = params["w2"].shape[-1]
    f32 = jnp.float32

    # --- wrapper-side (XLA) precompute: once per call, NOT per grid step ---
    wq, bq = params["wq"], params["bq"]
    wq_t = wq[:Dt, :].astype(compute_dtype)                      # target part of W_q   (Dt, Dm)
    qpos = (params["pos_emb"] @ wq[Dt:, :] + bq).astype(f32)     # batch-independent    (L, Dm)
    w1 = params["w1"]
    w1_fused = jnp.concatenate(                                  # fold (q - s) branch, then fuse
        [w1[0 * Dm_:1 * Dm_] + w1[2 * Dm_:3 * Dm_],              # q   branch
         w1[1 * Dm_:2 * Dm_] - w1[2 * Dm_:3 * Dm_],              # s   branch
         w1[3 * Dm_:4 * Dm_]],                                   # q*s branch
        axis=0).astype(compute_dtype)                            # (3*Dm, H1)

    target = target_emb.astype(compute_dtype)
    seq = sequence_emb.astype(compute_dtype)
    mask3 = mask.reshape(B_, L_, 1).astype(f32)                  # L stays on sublanes in-kernel

    # --- batch tile: largest multiple of 8 fitting a generation-aware VMEM budget ---
    in_bytes = jnp.dtype(compute_dtype).itemsize
    try:
        info = pltpu.get_tpu_info()
        vmem_phys = int(getattr(info, "vmem_capacity_bytes", 64 * 1024 * 1024))
    except Exception:
        vmem_phys = 64 * 1024 * 1024                  # v7x floor; v5e/v6e have 128 MiB
    vmem_limit = min(int(vmem_phys * 0.75), 112 * 1024 * 1024)   # ~48 MiB v7x, ~96 MiB v5e/v6e
    tile_budget = vmem_limit // 2                      # headroom for resident weights + scratch
    per_row = (2 * ((Dt + L_ * Dm_) * in_bytes + L_ * 4)         # double-buffered input tiles
               + 2 * (Dm_ + 1) * 4)                              # double-buffered output tiles
    if block_b is None:
        tb_cap = max(8, min(tile_budget // per_row, 1024) // 8 * 8)
        tb = min(_round_up(B_, 8), tb_cap)            # toy B=16 -> one grid step
    else:
        tb = block_b

    b_pad = _round_up(B_, tb)
    pad_b = b_pad - B_
    if pad_b:
        target = jnp.pad(target, ((0, pad_b), (0, 0)))
        seq = jnp.pad(seq, ((0, pad_b), (0, 0), (0, 0)))
        mask3 = jnp.pad(mask3, ((0, pad_b), (0, 0), (0, 0)))

    resident = lambda i: (0, 0)   # weights / precomputed tensors stay in VMEM across steps
    grid_spec = pltpu.PrefetchScalarGridSpec(
        num_scalar_prefetch=0,
        grid=(b_pad // tb,),
        in_specs=[
            pl.BlockSpec((tb, Dt), lambda i: (i, 0)),            # target
            pl.BlockSpec((tb, L_, Dm_), lambda i: (i, 0, 0)),    # sequence
            pl.BlockSpec((tb, L_, 1), lambda i: (i, 0, 0)),      # mask (B, L, 1)
            pl.BlockSpec((L_, Dm_), resident),                   # qpos (pos path + bias)
            pl.BlockSpec((Dt, Dm_), resident),                   # W_q (target part)
            pl.BlockSpec((1, Dm_), resident),                    # PReLU alpha
            pl.BlockSpec((3 * Dm_, H1_), resident),              # fused W1
            pl.BlockSpec((1, H1_), resident),                    # b1
            pl.BlockSpec((H1_, H2_), resident),                  # W2
            pl.BlockSpec((1, H2_), resident),                    # b2
            pl.BlockSpec((1, H2_), resident),                    # W3 (Linear(H2,1).weight)
            pl.BlockSpec((1, 1), resident),                      # b3
        ],
        out_specs=[pl.BlockSpec((tb, Dm_), lambda i: (i, 0)),    # attn_out
                   pl.BlockSpec((tb, 1), lambda i: (i, 0))],     # rel_i2i
    )

    attn, rel = pl.pallas_call(
        item2item_kernel,
        out_shape=(jax.ShapeDtypeStruct((b_pad, Dm_), f32),
                   jax.ShapeDtypeStruct((b_pad, 1), f32)),
        grid_spec=grid_spec,
        compiler_params=pltpu.CompilerParams(
            dimension_semantics=("parallel",),        # shard batch tiles across TCs (v7x)
            vmem_limit_bytes=int(vmem_limit),
        ),
    )(target, seq, mask3, qpos, wq_t, params["alpha"].astype(f32),
      w1_fused, params["b1"].astype(f32), params["w2"].astype(compute_dtype),
      params["b2"].astype(f32), params["w3"].astype(f32), params["b3"].astype(f32))

    return attn[:B_], rel[:B_]


def reference(target_emb, sequence_emb, mask, params):
    """Pure-JAX transcription of the PyTorch forward (for correctness check)."""
    B_, L_, Dm_ = sequence_emb.shape
    ctx = jnp.concatenate(
        [jnp.broadcast_to(target_emb[:, None, :], (B_, L_, target_emb.shape[-1])),
         jnp.broadcast_to(params["pos_emb"][None], (B_, L_, POS_EMB_DIM))], axis=-1)
    q = ctx.reshape(-1, CONTEXT_DIM) @ params["wq"] + params["bq"][0]
    q = jnp.where(q >= 0.0, q, params["alpha"][0] * q)
    q = q.reshape(B_, L_, Dm_)
    s = sequence_emb
    inp = jnp.concatenate([q, s, q - s, q * s], axis=-1).reshape(-1, 4 * Dm_)
    h1 = jax.nn.sigmoid(inp @ params["w1"] + params["b1"][0])
    h2 = jax.nn.sigmoid(h1 @ params["w2"] + params["b2"][0])
    score = (h2 @ params["w3"].T + params["b3"][0]).reshape(B_, L_)
    neg = jnp.where(mask == 0.0, -1e9, score)
    p = jax.nn.softmax(neg, axis=-1)
    attn_out = jnp.sum(p[:, :, None] * s, axis=1)
    rel = jnp.sum(jnp.where(mask == 0.0, 0.0, score), axis=-1, keepdims=True)
    return attn_out, rel


if __name__ == "__main__":
    key = jax.random.PRNGKey(0)
    ks = jax.random.split(key, 16)
    sc = 0.1
    params = {
        # NOTE: torch inits pos_emb to zeros; use a deterministic random init so the
        # positional path is actually exercised (same shapes as the module).
        "pos_emb": jax.random.normal(ks[0], (SEQ_LEN, POS_EMB_DIM), jnp.float32) * sc,
        "wq":    jax.random.normal(ks[1], (CONTEXT_DIM, MODEL_DIM), jnp.float32) * sc,
        "bq":    jax.random.normal(ks[2], (1, MODEL_DIM), jnp.float32) * sc,
        "alpha": jnp.full((1, MODEL_DIM), 0.1, jnp.float32),        # PReLU init=0.1
        "w1":    jax.random.normal(ks[3], (4 * MODEL_DIM, H1), jnp.float32) * sc,
        "b1":    jax.random.normal(ks[4], (1, H1), jnp.float32) * sc,
        "w2":    jax.random.normal(ks[5], (H1, H2), jnp.float32) * sc,
        "b2":    jax.random.normal(ks[6], (1, H2), jnp.float32) * sc,
        "w3":    jax.random.normal(ks[7], (1, H2), jnp.float32) * sc,   # Linear(H2,1).weight
        "b3":    jax.random.normal(ks[8], (1, 1), jnp.float32) * sc,
    }

    target_emb = jax.random.normal(ks[9], (B, TARGET_DIM), jnp.float32)
    sequence_emb = jax.random.normal(ks[10], (B, SEQ_LEN, MODEL_DIM), jnp.float32)
    lengths = jax.random.randint(ks[11], (B,), 1, SEQ_LEN + 1)
    mask = (jnp.arange(SEQ_LEN)[None, :] < lengths[:, None]).astype(jnp.float32)

    ref_attn, ref_rel = reference(target_emb, sequence_emb, mask, params)

    # f32 storage path: tight tolerance (slack only for the EUP approximate reciprocal).
    attn_out, rel_i2i = item2item_forward(target_emb, sequence_emb, mask, params)
    jax.block_until_ready((attn_out, rel_i2i))
    assert jnp.allclose(attn_out, ref_attn, atol=5e-3, rtol=5e-3), "attn_out mismatch (f32)"
    assert jnp.allclose(rel_i2i, ref_rel, atol=5e-3, rtol=5e-3), "rel_i2i mismatch (f32)"

    # bf16 storage path (v6e/v7x recommendation): matmul operands bf16, softmax kept in f32.
    attn_bf, rel_bf = item2item_forward(target_emb, sequence_emb, mask, params,
                                        compute_dtype=jnp.bfloat16)
    jax.block_until_ready((attn_bf, rel_bf))
    assert jnp.allclose(attn_bf, ref_attn, atol=5e-2, rtol=5e-2), "attn_out mismatch (bf16)"
    assert jnp.allclose(rel_bf, ref_rel, atol=5e-2, rtol=5e-2), "rel_i2i mismatch (bf16)"

    print("KERNEL_OK")
</pallas_src>

<mosaic_0001>
module attributes {stable_mosaic.version = 11 : i64} {
  func.func @item2item_kernel(%arg0: i32, %arg1: memref<16x64xf32, #tpu.memory_space<vmem>>, %arg2: memref<16x8x32xf32, #tpu.memory_space<vmem>>, %arg3: memref<16x8x1xf32, #tpu.memory_space<vmem>>, %arg4: memref<8x32xf32, #tpu.memory_space<vmem>>, %arg5: memref<64x32xf32, #tpu.memory_space<vmem>>, %arg6: memref<1x32xf32, #tpu.memory_space<vmem>>, %arg7: memref<96x16xf32, #tpu.memory_space<vmem>>, %arg8: memref<1x16xf32, #tpu.memory_space<vmem>>, %arg9: memref<16x8xf32, #tpu.memory_space<vmem>>, %arg10: memref<1x8xf32, #tpu.memory_space<vmem>>, %arg11: memref<1x8xf32, #tpu.memory_space<vmem>>, %arg12: memref<1x1xf32, #tpu.memory_space<vmem>>, %arg13: memref<16x32xf32, #tpu.memory_space<vmem>>, %arg14: memref<16x1xf32, #tpu.memory_space<vmem>>) attributes {dimension_semantics = [#tpu.dimension_semantics<parallel>], iteration_bounds = array<i64: 1>, scalar_prefetch = 0 : i64, scratch_operands = 0 : i64, tpu.core_type = #tpu.core_type<tc>, window_params = [{transform_indices = @transform_0, window_bounds = array<i64: 16, 64>}, {transform_indices = @transform_1, window_bounds = array<i64: 16, 8, 32>}, {transform_indices = @transform_2, window_bounds = array<i64: 16, 8, 1>}, {pipeline_mode = #tpu.pipeline_mode<synchronous>, transform_indices = @transform_3, window_bounds = array<i64: 8, 32>}, {pipeline_mode = #tpu.pipeline_mode<synchronous>, transform_indices = @transform_4, window_bounds = array<i64: 64, 32>}, {pipeline_mode = #tpu.pipeline_mode<synchronous>, transform_indices = @transform_5, window_bounds = array<i64: 1, 32>}, {pipeline_mode = #tpu.pipeline_mode<synchronous>, transform_indices = @transform_6, window_bounds = array<i64: 96, 16>}, {pipeline_mode = #tpu.pipeline_mode<synchronous>, transform_indices = @transform_7, window_bounds = array<i64: 1, 16>}, {pipeline_mode = #tpu.pipeline_mode<synchronous>, transform_indices = @transform_8, window_bounds = array<i64: 16, 8>}, {pipeline_mode = #tpu.pipeline_mode<synchronous>, transform_indices = @transform_9, window_bounds = array<i64: 1, 8>}, {pipeline_mode = #tpu.pipeline_mode<synchronous>, transform_indices = @transform_10, window_bounds = array<i64: 1, 8>}, {pipeline_mode = #tpu.pipeline_mode<synchronous>, transform_indices = @transform_11, window_bounds = array<i64: 1, 1>}, {transform_indices = @transform_12, window_bounds = array<i64: 16, 32>}, {transform_indices = @transform_13, window_bounds = array<i64: 16, 1>}]} {
    %c0 = arith.constant 0 : index
    %c0_0 = arith.constant 0 : index
    %0 = vector.load %arg1[%c0, %c0_0] : memref<16x64xf32, #tpu.memory_space<vmem>>, vector<16x64xf32>
    %c0_1 = arith.constant 0 : index
    %c0_2 = arith.constant 0 : index
    %1 = vector.load %arg5[%c0_1, %c0_2] : memref<64x32xf32, #tpu.memory_space<vmem>>, vector<64x32xf32>
    %cst = arith.constant dense<0.000000e+00> : vector<16x32xf32>
    %2 = tpu.matmul %0, %1, %cst {dimension_numbers = #tpu.dot_dimension_numbers<[1], [0], [0], [1], [0, 0, 1, 1], [], []>} : vector<16x64xf32>, vector<64x32xf32>, vector<16x32xf32> -> vector<16x32xf32>
    %3 = vector.shape_cast %2 : vector<16x32xf32> to vector<16x1x32xf32>
    %c0_3 = arith.constant 0 : index
    %c0_4 = arith.constant 0 : index
    %4 = vector.load %arg4[%c0_3, %c0_4] : memref<8x32xf32, #tpu.memory_space<vmem>>, vector<8x32xf32>
    %5 = vector.shape_cast %4 : vector<8x32xf32> to vector<1x8x32xf32>
    %6 = vector.broadcast %3 : vector<16x1x32xf32> to vector<16x8x32xf32>
    %7 = vector.broadcast %5 : vector<1x8x32xf32> to vector<16x8x32xf32>
    %8 = arith.addf %6, %7 : vector<16x8x32xf32>
    %c0_5 = arith.constant 0 : index
    %c0_6 = arith.constant 0 : index
    %9 = vector.load %arg6[%c0_5, %c0_6] : memref<1x32xf32, #tpu.memory_space<vmem>>, vector<1x32xf32>
    %cst_7 = arith.constant 0.000000e+00 : f32
    %10 = vector.broadcast %cst_7 : f32 to vector<16x8x32xf32>
    %11 = arith.cmpf oge, %8, %10 : vector<16x8x32xf32>
    %12 = vector.shape_cast %9 : vector<1x32xf32> to vector<1x1x32xf32>
    %13 = vector.broadcast %12 : vector<1x1x32xf32> to vector<16x8x32xf32>
    %14 = arith.mulf %13, %8 : vector<16x8x32xf32>
    %15 = arith.select %11, %8, %14 : vector<16x8x32xi1>, vector<16x8x32xf32>
    %c0_8 = arith.constant 0 : index
    %c0_9 = arith.constant 0 : index
    %c0_10 = arith.constant 0 : index
    %16 = vector.load %arg2[%c0_8, %c0_9, %c0_10] : memref<16x8x32xf32, #tpu.memory_space<vmem>>, vector<16x8x32xf32>
    %17 = vector.shape_cast %15 : vector<16x8x32xf32> to vector<128x32xf32>
    %18 = vector.shape_cast %16 : vector<16x8x32xf32> to vector<128x32xf32>
    %19 = arith.mulf %15, %16 : vector<16x8x32xf32>
    %20 = vector.shape_cast %19 : vector<16x8x32xf32> to vector<128x32xf32>
    %21 = tpu.concatenate %17, %18, %20 in 1 : vector<128x32xf32>, vector<128x32xf32>, vector<128x32xf32> -> vector<128x96xf32>
    %c0_11 = arith.constant 0 : index
    %c0_12 = arith.constant 0 : index
    %22 = vector.load %arg7[%c0_11, %c0_12] : memref<96x16xf32, #tpu.memory_space<vmem>>, vector<96x16xf32>
    %cst_13 = arith.constant dense<0.000000e+00> : vector<128x16xf32>
    %23 = tpu.matmul %21, %22, %cst_13 {dimension_numbers = #tpu.dot_dimension_numbers<[1], [0], [0], [1], [0, 0, 1, 1], [], []>} : vector<128x96xf32>, vector<96x16xf32>, vector<128x16xf32> -> vector<128x16xf32>
    %c0_14 = arith.constant 0 : index
    %c0_15 = arith.constant 0 : index
    %24 = vector.load %arg8[%c0_14, %c0_15] : memref<1x16xf32, #tpu.memory_space<vmem>>, vector<1x16xf32>
    %25 = vector.broadcast %24 : vector<1x16xf32> to vector<128x16xf32>
    %26 = arith.addf %23, %25 : vector<128x16xf32>
    %27 = arith.negf %26 : vector<128x16xf32>
    %28 = math.exp %27 : vector<128x16xf32>
    %cst_16 = arith.constant 1.000000e+00 : f32
    %29 = vector.broadcast %cst_16 : f32 to vector<128x16xf32>
    %30 = arith.addf %29, %28 : vector<128x16xf32>
    %31 = arith.divf %29, %30 : vector<128x16xf32>
    %c0_17 = arith.constant 0 : index
    %c0_18 = arith.constant 0 : index
    %32 = vector.load %arg9[%c0_17, %c0_18] : memref<16x8xf32, #tpu.memory_space<vmem>>, vector<16x8xf32>
    %cst_19 = arith.constant dense<0.000000e+00> : vector<128x8xf32>
    %33 = tpu.matmul %31, %32, %cst_19 {dimension_numbers = #tpu.dot_dimension_numbers<[1], [0], [0], [1], [0, 0, 1, 1], [], []>} : vector<128x16xf32>, vector<16x8xf32>, vector<128x8xf32> -> vector<128x8xf32>
    %c0_20 = arith.constant 0 : index
    %c0_21 = arith.constant 0 : index
    %34 = vector.load %arg10[%c0_20, %c0_21] : memref<1x8xf32, #tpu.memory_space<vmem>>, vector<1x8xf32>
    %35 = vector.broadcast %34 : vector<1x8xf32> to vector<128x8xf32>
    %36 = arith.addf %33, %35 : vector<128x8xf32>
    %37 = arith.negf %36 : vector<128x8xf32>
    %38 = math.exp %37 : vector<128x8xf32>
    %cst_22 = arith.constant 1.000000e+00 : f32
    %39 = vector.broadcast %cst_22 : f32 to vector<128x8xf32>
    %40 = arith.addf %39, %38 : vector<128x8xf32>
    %41 = arith.divf %39, %40 : vector<128x8xf32>
    %42 = vector.shape_cast %41 : vector<128x8xf32> to vector<16x8x8xf32>
    %c0_23 = arith.constant 0 : index
    %c0_24 = arith.constant 0 : index
    %43 = vector.load %arg11[%c0_23, %c0_24] : memref<1x8xf32, #tpu.memory_space<vmem>>, vector<1x8xf32>
    %44 = vector.shape_cast %43 : vector<1x8xf32> to vector<1x1x8xf32>
    %45 = vector.broadcast %44 : vector<1x1x8xf32> to vector<16x8x8xf32>
    %46 = arith.mulf %42, %45 : vector<16x8x8xf32>
    %cst_25 = arith.constant dense<0.000000e+00> : vector<16x8xf32>
    %47 = vector.multi_reduction <add>, %46, %cst_25 [2] : vector<16x8x8xf32> to vector<16x8xf32>
    %48 = vector.shape_cast %47 : vector<16x8xf32> to vector<16x8x1xf32>
    %c0_26 = arith.constant 0 : index
    %c0_27 = arith.constant 0 : index
    %49 = vector.load %arg12[%c0_26, %c0_27] : memref<1x1xf32, #tpu.memory_space<vmem>>, vector<1x1xf32>
    %50 = vector.shape_cast %49 : vector<1x1xf32> to vector<1x1x1xf32>
    %51 = vector.broadcast %50 : vector<1x1x1xf32> to vector<16x8x1xf32>
    %52 = arith.addf %48, %51 : vector<16x8x1xf32>
    %c0_28 = arith.constant 0 : index
    %c0_29 = arith.constant 0 : index
    %c0_30 = arith.constant 0 : index
    %53 = vector.load %arg3[%c0_28, %c0_29, %c0_30] : memref<16x8x1xf32, #tpu.memory_space<vmem>>, vector<16x8x1xf32>
    %cst_31 = arith.constant 0.000000e+00 : f32
    %54 = vector.broadcast %cst_31 : f32 to vector<16x8x1xf32>
    %55 = arith.cmpf oeq, %53, %54 : vector<16x8x1xf32>
    %cst_32 = arith.constant -1.000000e+09 : f32
    %56 = vector.broadcast %cst_32 : f32 to vector<16x8x1xf32>
    %57 = arith.select %55, %56, %52 : vector<16x8x1xi1>, vector<16x8x1xf32>
    %cst_33 = arith.constant dense<0xFF800000> : vector<16x1xf32>
    %58 = vector.multi_reduction <maximumf>, %57, %cst_33 [1] : vector<16x8x1xf32> to vector<16x1xf32>
    %59 = vector.shape_cast %58 : vector<16x1xf32> to vector<16x1x1xf32>
    %60 = vector.broadcast %59 : vector<16x1x1xf32> to vector<16x8x1xf32>
    %61 = arith.subf %57, %60 : vector<16x8x1xf32>
    %62 = math.exp %61 : vector<16x8x1xf32>
    %cst_34 = arith.constant dense<0.000000e+00> : vector<16x1xf32>
    %63 = vector.multi_reduction <add>, %62, %cst_34 [1] : vector<16x8x1xf32> to vector<16x1xf32>
    %64 = vector.shape_cast %63 : vector<16x1xf32> to vector<16x1x1xf32>
    %65 = tpu.reciprocal %64 {approx = true} : vector<16x1x1xf32> -> vector<16x1x1xf32>
    %66 = vector.broadcast %65 : vector<16x1x1xf32> to vector<16x8x1xf32>
    %67 = arith.mulf %62, %66 : vector<16x8x1xf32>
    %68 = vector.broadcast %67 : vector<16x8x1xf32> to vector<16x8x32xf32>
    %69 = arith.mulf %68, %16 : vector<16x8x32xf32>
    %cst_35 = arith.constant dense<0.000000e+00> : vector<16x32xf32>
    %70 = vector.multi_reduction <add>, %69, %cst_35 [1] : vector<16x8x32xf32> to vector<16x32xf32>
    %c0_36 = arith.constant 0 : index
    %c0_37 = arith.constant 0 : index
    %71 = vector.load %arg13[%c0_36, %c0_37] : memref<16x32xf32, #tpu.memory_space<vmem>>, vector<16x32xf32>
    tpu.vector_store %arg13[%c0_36, %c0_37], %70 {strides = array<i32>} : memref<16x32xf32, #tpu.memory_space<vmem>>, vector<16x32xf32>,
    %cst_38 = arith.constant 0.000000e+00 : f32
    %72 = vector.broadcast %cst_38 : f32 to vector<16x8x1xf32>
    %73 = arith.select %55, %72, %52 : vector<16x8x1xi1>, vector<16x8x1xf32>
    %cst_39 = arith.constant dense<0.000000e+00> : vector<16x1xf32>
    %74 = vector.multi_reduction <add>, %73, %cst_39 [1] : vector<16x8x1xf32> to vector<16x1xf32>
    %c0_40 = arith.constant 0 : index
    %c0_41 = arith.constant 0 : index
    %75 = vector.load %arg14[%c0_40, %c0_41] : memref<16x1xf32, #tpu.memory_space<vmem>>, vector<16x1xf32>
    tpu.vector_store %arg14[%c0_40, %c0_41], %74 {strides = array<i32>} : memref<16x1xf32, #tpu.memory_space<vmem>>, vector<16x1xf32>,
    return
  }
  func.func @transform_0(%arg0: i32) -> (i32, i32) {
    %c0_i32 = arith.constant 0 : i32
    %c0_i32_0 = arith.constant 0 : i32
    return %arg0, %c0_i32 : i32, i32
  }
  func.func @transform_1(%arg0: i32) -> (i32, i32, i32) {
    %c0_i32 = arith.constant 0 : i32
    %c0_i32_0 = arith.constant 0 : i32
    %c0_i32_1 = arith.constant 0 : i32
    return %arg0, %c0_i32, %c0_i32_0 : i32, i32, i32
  }
  func.func @transform_2(%arg0: i32) -> (i32, i32, i32) {
    %c0_i32 = arith.constant 0 : i32
    %c0_i32_0 = arith.constant 0 : i32
    %c0_i32_1 = arith.constant 0 : i32
    return %arg0, %c0_i32, %c0_i32_0 : i32, i32, i32
  }
  func.func @transform_3(%arg0: i32) -> (i32, i32) {
    %c0_i32 = arith.constant 0 : i32
    %c0_i32_0 = arith.constant 0 : i32
    %c0_i32_1 = arith.constant 0 : i32
    return %c0_i32, %c0_i32_0 : i32, i32
  }
  func.func @transform_4(%arg0: i32) -> (i32, i32) {
    %c0_i32 = arith.constant 0 : i32
    %c0_i32_0 = arith.constant 0 : i32
    %c0_i32_1 = arith.constant 0 : i32
    return %c0_i32, %c0_i32_0 : i32, i32
  }
  func.func @transform_5(%arg0: i32) -> (i32, i32) {
    %c0_i32 = arith.constant 0 : i32
    %c0_i32_0 = arith.constant 0 : i32
    %c0_i32_1 = arith.constant 0 : i32
    return %c0_i32, %c0_i32_0 : i32, i32
  }
  func.func @transform_6(%arg0: i32) -> (i32, i32) {
    %c0_i32 = arith.constant 0 : i32
    %c0_i32_0 = arith.constant 0 : i32
    %c0_i32_1 = arith.constant 0 : i32
    return %c0_i32, %c0_i32_0 : i32, i32
  }
  func.func @transform_7(%arg0: i32) -> (i32, i32) {
    %c0_i32 = arith.constant 0 : i32
    %c0_i32_0 = arith.constant 0 : i32
    %c0_i32_1 = arith.constant 0 : i32
    return %c0_i32, %c0_i32_0 : i32, i32
  }
  func.func @transform_8(%arg0: i32) -> (i32, i32) {
    %c0_i32 = arith.constant 0 : i32
    %c0_i32_0 = arith.constant 0 : i32
    %c0_i32_1 = arith.constant 0 : i32
    return %c0_i32, %c0_i32_0 : i32, i32
  }
  func.func @transform_9(%arg0: i32) -> (i32, i32) {
    %c0_i32 = arith.constant 0 : i32
    %c0_i32_0 = arith.constant 0 : i32
    %c0_i32_1 = arith.constant 0 : i32
    return %c0_i32, %c0_i32_0 : i32, i32
  }
  func.func @transform_10(%arg0: i32) -> (i32, i32) {
    %c0_i32 = arith.constant 0 : i32
    %c0_i32_0 = arith.constant 0 : i32
    %c0_i32_1 = arith.constant 0 : i32
    return %c0_i32, %c0_i32_0 : i32, i32
  }
  func.func @transform_11(%arg0: i32) -> (i32, i32) {
    %c0_i32 = arith.constant 0 : i32
    %c0_i32_0 = arith.constant 0 : i32
    %c0_i32_1 = arith.constant 0 : i32
    return %c0_i32, %c0_i32_0 : i32, i32
  }
  func.func @transform_12(%arg0: i32) -> (i32, i32) {
    %c0_i32 = arith.constant 0 : i32
    %c0_i32_0 = arith.constant 0 : i32
    return %arg0, %c0_i32 : i32, i32
  }
  func.func @transform_13(%arg0: i32) -> (i32, i32) {
    %c0_i32 = arith.constant 0 : i32
    %c0_i32_0 = arith.constant 0 : i32
    return %arg0, %c0_i32 : i32, i32
  }
}

</mosaic_0001>

<bundles_post_ra>
// kernel: tpu_custom_call.1
= control target key start
LH: loop header
LB: loop body
LE: loop exit
PB: predicated region body
PF: predicated region fallthrough
CT: control target
= control target key end

     0   :  { %s3587_s0 = inlined_call_operand.vmem [shape: f32[16,64], index: 0, kind: input, shape index: {}]   ;;  %s3588_s1 = inlined_call_operand.vmem [shape: f32[16,8,32], index: 1, kind: input, shape index: {}]   ;;  %s3589_s2 = inlined_call_operand.vmem [shape: f32[16,8,1], index: 2, kind: input, shape index: {}]   ;;  %s3590_s3 = inlined_call_operand.vmem [shape: f32[8,32], index: 3, kind: input, shape index: {}]   ;;  %s3591_s4 = inlined_call_operand.vmem [shape: f32[64,32], index: 4, kind: input, shape index: {}]   ;;  %s3592_s5 = inlined_call_operand.vmem [shape: f32[1,32], index: 5, kind: input, shape index: {}]   ;;  %s3593_s6 = inlined_call_operand.vmem [shape: f32[96,16], index: 6, kind: input, shape index: {}]   ;;  %s3594_s7 = inlined_call_operand.vmem [shape: f32[1,16], index: 7, kind: input, shape index: {}]   ;;  %s3595_s8 = inlined_call_operand.vmem [shape: f32[16,8], index: 8, kind: input, shape index: {}]   ;;  %s3596_s9 = inlined_call_operand.vmem [shape: f32[1,8], index: 9, kind: input, shape index: {}]   ;;  %s3597_s10 = inlined_call_operand.vmem [shape: f32[1,8], index: 10, kind: input, shape index: {}]   ;;  %s3598_s11 = inlined_call_operand.<no memory space> [shape: f32[1,1], index: 11, kind: input, shape index: {}]   ;;  %s3599_s12 = inlined_call_operand.hbm [shape: f32[16,32], index: 12, kind: output, shape index: {0}]   ;;  %s3600_s13 = inlined_call_operand.vmem [shape: f32[16,1], index: 13, kind: output, shape index: {1}]  }
   0x1   :  { %v19_v0 = vstv %s3598_s11 }
   0x2   :  { %20 = vst [vmem:[#allocation2] sm:$0x1] %v19_v0 }
   0x3   :  { %v55_v1 = vld [vmem:[%s3591_s4 + $0x38] sm:$0xff]  ;;  %v54_v2 = vld [vmem:[%s3591_s4 + $0x30] sm:$0xff]  ;;  %vm56_vm0 = vcmask 523264   ;;  %v53_v3 = vld [vmem:[%s3591_s4 + $0x28] sm:$0xff]  ;;  %s2531_s21 = smov 32  }
   0x4   :  { %2197 = vmatprep.subr.mxu0 %v55_v1  ;;  %v46_v4 = vld [vmem:[%s3587_s0] sm:$0xff]  ;;  %v2637_v7 = vld [vmem:[%s3588_s1 + $0x18] sm:$0xff]  ;;  %v2642_v8 = vld [vmem:[%s3588_s1 + $0x8] sm:$0xff] }
   0x5   :  { %2198 = vmatpush3.msra.mxu0 %v55_v1  ;;  %2213 = vmatprep.mubr.msk.f32.mxu0 %vm56_vm0, %v46_v4  ;;  %v2627_v5 = vld [vmem:[%s3588_s1] sm:$0xff]  ;;  %v51_v9 = vld [vmem:[%s3591_s4 + $0x18] sm:$0xff]  ;;  %v2652_v10 = vld [vmem:[%s3588_s1 + $0x28] sm:$0xff] }
   0x6   :  { %2199 = vmatprep.subr.mxu0 %v54_v2  ;;  %v52_v6 = vld [vmem:[%s3591_s4 + $0x20] sm:$0xff]  ;;  %438 = vrot.lane.b32.xlu0 %v2627_v5, %s2531_s21 }
   0x7   :  { %2200 = vmatpush3.msra.mxu0 %v54_v2  ;;  %444 = vrot.lane.b32.xlu1 %v2637_v7, %s2531_s21 }
   0x8   :  { %2201 = vmatprep.subr.mxu0 %v53_v3 }
   0x9   :  { %2202 = vmatpush3.msra.mxu0 %v53_v3 }
   0xa   :  { %2203 = vmatprep.subr.mxu0 %v52_v6 }
   0xb   :  { %21 = vsyncpa [#allocation4], 0  ;;  %2204 = vmatpush3.msra.mxu0 %v52_v6  ;;  %v50_v11 = vld [vmem:[%s3591_s4 + $0x10] sm:$0xff]  ;;  %440 = vrot.lane.b32.xlu0 %v2642_v8, %s2531_s21  ;;  %v49_v13 = vld [vmem:[%s3591_s4 + $0x8] sm:$0xff]  ;;  %v2532_v30 = vmov 1966171168   ;;  %v144_v32 = vlaneseq }
   0xc   :  { %2205 = vmatprep.subr.mxu0 %v51_v9  ;;  %v2662_v12 = vld [vmem:[%s3588_s1 + $0x10] sm:$0xff]  ;;  %448 = vrot.lane.b32.xlu1 %v2652_v10, %s2531_s21  ;;  %v2672_v14 = vld [vmem:[%s3588_s1 + $0x38] sm:$0xff]  ;;  %v48_v15 = vld [vmem:[%s3591_s4] sm:$0xff]  ;;  %v142_v31 = vunpack.c.l.s4 %v2532_v30  ;;  %s2533_s20 = smov 64  }
   0xd   :  { %2206 = vmatpush3.msra.mxu0 %v51_v9  ;;  %v2682_v16 = vld [vmem:[%s3588_s1 + $0x20] sm:$0xff]  ;;  %v47_v17 = vld [vmem:[%s3587_s0 + $0x8] sm:$0xff]  ;;  %v2700_v19 = vld [vmem:[%s3588_s1 + $0x30] sm:$0xff]  ;;  %v145_v34 = vshrl.u32 %v144_v32, 7 }
   0xe   :  { %2207 = vmatprep.subr.mxu0 %v50_v11  ;;  %v2692_v18 = vld [vmem:[%s3588_s1 + $0x48] sm:$0xff]  ;;  %v2707_v20 = vld [vmem:[%s3588_s1 + $0x58] sm:$0xff]  ;;  %v2714_v21 = vld [vmem:[%s3588_s1 + $0x40] sm:$0xff]  ;;  %v143_v33 = vunpack.c.0.s8 %v142_v31 }
   0xf   :  { %2208 = vmatpush3.msra.mxu0 %v50_v11  ;;  %442 = vrot.lane.b32.xlu0 %v2662_v12, %s2531_s21  ;;  %v2723_v22 = vld [vmem:[%s3588_s1 + $0x50] sm:$0xff]  ;;  %v594_v23 = vld [vmem:[%s3593_s6 + $0x58] sm:$0xff]  ;;  %v592_v25 = vld [vmem:[%s3593_s6 + $0x48] sm:$0xff]  ;;  %v2751_v38 = vsub.s32 0, %v145_v34 }
  0x10   :  { %2209 = vmatprep.subr.mxu0 %v49_v13  ;;  %452 = vrot.lane.b32.xlu1 %v2672_v14, %s2531_s21  ;;  %v593_v24 = vld [vmem:[%s3593_s6 + $0x50] sm:$0xff]  ;;  %v591_v26 = vld [vmem:[%s3593_s6 + $0x40] sm:$0xff]  ;;  %v590_v27 = vld [vmem:[%s3593_s6 + $0x38] sm:$0xff]  ;;  %v2748_v35 = vsub.s32 %v143_v33, %v145_v34 }
  0x11   :  { %2210 = vmatpush3.msra.mxu0 %v49_v13  ;;  %2216 = vmatprep.subr.mxu1 %v594_v23  ;;  %v589_v28 = vld [vmem:[%s3593_s6 + $0x30] sm:$0xff]  ;;  %v588_v29 = vld [vmem:[%s3593_s6 + $0x28] sm:$0xff]  ;;  %v2757_v43 = vld [vmem:[%s3590_s3] sm:$0xff] }
  0x12   :  { %2211 = vmatprep.subr.mxu0 %v48_v15  ;;  %2217 = vmatpush3.msra.mxu1 %v594_v23  ;;  %v587_v44 = vld [vmem:[%s3593_s6 + $0x20] sm:$0xff]  ;;  %v586_v58 = vld [vmem:[%s3593_s6 + $0x18] sm:$0xff]  ;;  %v585_v0 = vld [vmem:[%s3593_s6 + $0x10] sm:$0xff] }
  0x13   :  { %2212 = vmatpush3.msra.mxu0 %v48_v15  ;;  %446 = vrot.lane.b32.xlu0 %v2682_v16, %s2531_s21  ;;  %v2769_v50 = vld [vmem:[%s3592_s5] ss:$0 sm:$0xff]  ;;  %v584_v15 = vld [vmem:[%s3593_s6 + $0x8] sm:$0xff] }
  0x14   :  { %2214 = vmatmul.mubr.msk.f32.vlgmr.msra.gmra.mxu0 %vm56_vm0, %v47_v17  ;;  %456 = vrot.lane.b32.xlu1 %v2692_v18, %s2531_s21  ;;  %v583_v17 = vld [vmem:[%s3593_s6] sm:$0xff] }
  0x15   :  { %2218 = vmatprep.subr.mxu1 %v593_v24 }
  0x16   :  { %2219 = vmatpush3.msra.mxu1 %v593_v24 }
  0x17   :  { %450 = vrot.lane.b32.xlu0 %v2700_v19, %s2531_s21  ;;  %2220 = vmatprep.subr.mxu1 %v592_v25 }
  0x18   :  { %460 = vrot.lane.b32.xlu1 %v2707_v20, %s2531_s21  ;;  %2221 = vmatpush3.msra.mxu1 %v592_v25 }
  0x19   :  { %2222 = vmatprep.subr.mxu1 %v591_v26 }
  0x1a   :  { %2223 = vmatpush3.msra.mxu1 %v591_v26 }
  0x1b   :  { %454 = vrot.lane.b32.xlu0 %v2714_v21, %s2531_s21  ;;  %2224 = vmatprep.subr.mxu1 %v590_v27 }
  0x1c   :  { %2225 = vmatpush3.msra.mxu1 %v590_v27 }
  0x1d   :  { %2226 = vmatprep.subr.mxu1 %v589_v28 }
  0x1e   :  { %2227 = vmatpush3.msra.mxu1 %v589_v28 }
  0x1f   :  { %458 = vrot.lane.b32.xlu0 %v2723_v22, %s2531_s21  ;;  %2228 = vmatprep.subr.mxu1 %v588_v29 }
  0x20   :  { %2229 = vmatpush3.msra.mxu1 %v588_v29 }
  0x21   :  { %2230 = vmatprep.subr.mxu1 %v587_v44 }
  0x22   :  { %2231 = vmatpush3.msra.mxu1 %v587_v44 }
  0x23   :  { %2232 = vmatprep.subr.mxu1 %v586_v58 }
  0x24   :  { %2233 = vmatpush3.msra.mxu1 %v586_v58 }
  0x25   :  { %2234 = vmatprep.subr.mxu1 %v585_v0 }
  0x26   :  { %2235 = vmatpush3.msra.mxu1 %v585_v0 }
  0x27   :  { %2236 = vmatprep.subr.mxu1 %v584_v15 }
  0x28   :  { %2237 = vmatpush3.msra.mxu1 %v584_v15 }
  0x29   :  { %2238 = vmatprep.subr.mxu1 %v583_v17 }
  0x2a   :  { %2239 = vmatpush3.msra.mxu1 %v583_v17 }
  0xd4   :  { %v2215_v36 = vpop.f32.mrf.mxu0 }
  0xd5   :  { %v196_v37 = vrot.slane %v2215_v36, %v2748_v35  ;;  %v189_v59 = vcombine.high %v2215_v36, %v2215_v36 }
  0xd6   :  { %v129_v39 = vpop.f32.mrf.mxu0 }
  0xd7   :  { %v212_v40 = vrot.slane %v196_v37, %v2748_v35  ;;  %v140_v41 = vcombine.high %v129_v39, %v129_v39  ;;  %v204_v42 = vcombine.high %v196_v37, %v196_v37  ;;  %v147_v46 = vrot.slane %v129_v39, %v2748_v35 }
  0xd8   :  { %v2792_v9 = vrot.slane %v189_v59, %v2748_v35 }
  0xd9   :  { %v274_v45 = vrot.slane %v212_v40, %v2751_v38  ;;  %v234_v47 = vcombine.high %v212_v40, %v212_v40  ;;  %v154_v49 = vrot.slane %v140_v41, %v2748_v35  ;;  %v226_v51 = vrot.slane %v204_v42, %v2748_v35 }
  0xda   :  { %v163_v52 = vrot.slane %v147_v46, %v2748_v35  ;;  %v155_v53 = vcombine.high %v147_v46, %v147_v46  ;;  %v219_v33 = vrot.slane %v2792_v9, %v2748_v35 }
  0xdb   :  { %v327_v48 = vadd.f32 %v274_v45, %v2757_v43  ;;  %v282_v55 = vrot.slane %v234_v47, %v2751_v38  ;;  %v170_v56 = vrot.slane %v154_v49, %v2748_v35  ;;  %v278_v57 = vrot.slane %v226_v51, %v2751_v38 }
  0xdc   :  { %v242_v60 = vrot.slane %v163_v52, %v2751_v38  ;;  %v177_v62 = vrot.slane %v155_v53, %v2748_v35  ;;  %v185_v63 = vcombine.high %v163_v52, %v163_v52  ;;  %v236_v4 = vcombine.high %v226_v51, %v226_v51 }
  0xdd   :  { %vm344_vm1 = vcmp.ge.f32.partialorder %v327_v48, 0.0  ;;  %v366_v54 = vmul.f32 %v2769_v50, %v327_v48  ;;  %v186_v1 = vcombine.high %v170_v56, %v170_v56  ;;  %v329_v2 = vadd.f32 %v282_v55, %v2757_v43 }
  0xde   :  { %v328_v6 = vadd.f32 %v278_v57, %v2757_v43  ;;  %v156_v11 = vcombine.high %v154_v49, %v154_v49  ;;  %v319_v13 = vadd.f32 %v242_v60, %v2757_v43  ;;  %v250_v23 = vrot.slane %v185_v63, %v2751_v38 }
  0xdf   :  { %v2781_v61 = vsel %vm344_vm1, %v327_v48, %v366_v54  ;;  %vm346_vm2 = vcmp.ge.f32.partialorder %v329_v2, 0.0  ;;  %v368_v24 = vmul.f32 %v2769_v50, %v329_v2  ;;  %v187_v25 = vcombine.high %v177_v62, %v177_v62 }
  0xe0   :  { %v414_v3 = vmul.f32 %v2714_v21, %v2781_v61  ;;  %v246_v21 = vrot.slane %v177_v62, %v2751_v38  ;;  %v258_v26 = vrot.slane %v170_v56, %v2751_v38  ;;  %v266_v27 = vrot.slane %v186_v1, %v2751_v38 }
  0xe1   :  { %v286_v28 = vrot.slane %v236_v4, %v2751_v38  ;;  %v367_v29 = vmul.f32 %v2769_v50, %v328_v6  ;;  %v2809_v30 = vsel %vm346_vm2, %v329_v2, %v368_v24  ;;  %vm345_vm3 = vcmp.ge.f32.partialorder %v328_v6, 0.0 }
  0xe2   :  { %518 = vrot.lane.b32.xlu0 %v414_v3, %s2533_s20  ;;  %vm336_vm4 = vcmp.ge.f32.partialorder %v319_v13, 0.0  ;;  %v358_v31 = vmul.f32 %v2769_v50, %v319_v13  ;;  %v416_v32 = vmul.f32 %v2723_v22, %v2809_v30  ;;  %v184_v34 = vrot.slane %v156_v11, %v2748_v35 }
  0xe3   :  { %v321_v36 = vadd.f32 %v250_v23, %v2757_v43  ;;  %v320_v37 = vadd.f32 %v246_v21, %v2757_v43  ;;  %v254_v39 = vrot.slane %v187_v25, %v2751_v38  ;;  %v325_v40 = vadd.f32 %v266_v27, %v2757_v43 }
  0xe4   :  { %v2821_v41 = vsel %vm336_vm4, %v319_v13, %v358_v31  ;;  %v323_v22 = vadd.f32 %v258_v26, %v2757_v43  ;;  %v2825_v42 = vsel %vm345_vm3, %v328_v6, %v367_v29  ;;  %v330_v46 = vadd.f32 %v286_v28, %v2757_v43 }
  0xe5   :  { %v406_v44 = vmul.f32 %v2627_v5, %v2821_v41  ;;  %vm338_vm5 = vcmp.ge.f32.partialorder %v321_v36, 0.0  ;;  %v360_v45 = vmul.f32 %v2769_v50, %v321_v36  ;;  %v359_v47 = vmul.f32 %v2769_v50, %v320_v37 }
  0xe6   :  { %522 = vrot.lane.b32.xlu0 %v416_v32, %s2533_s20  ;;  %vm340_vm6 = vcmp.ge.f32.partialorder %v323_v22, 0.0  ;;  %v362_v48 = vmul.f32 %v2769_v50, %v323_v22  ;;  %vm337_vm7 = vcmp.ge.f32.partialorder %v320_v37, 0.0  ;;  %v290_v51 = vrot.slane %v219_v33, %v2751_v38 }
  0xe7   :  { %502 = vrot.lane.b32.xlu1 %v406_v44, %s2533_s20  ;;  %v2834_v49 = vsel %vm338_vm5, %v321_v36, %v360_v45  ;;  %v188_v52 = vcombine.high %v184_v34, %v184_v34  ;;  %v262_v53 = vrot.slane %v184_v34, %v2751_v38  ;;  %v364_v54 = vmul.f32 %v2769_v50, %v325_v40  ;;  %v405_v44 = vld [vmem:[%s3588_s1 + $0x78] sm:$0xff] }
  0xe8   :  { %v408_v5 = vmul.f32 %v2662_v12, %v2834_v49  ;;  %v415_v55 = vmul.f32 %v2692_v18, %v2825_v42  ;;  %v2843_v56 = vsel %vm340_vm6, %v323_v22, %v362_v48  ;;  %vm342_vm8 = vcmp.ge.f32.partialorder %v325_v40, 0.0 }
  0xe9   :  { %v369_v57 = vmul.f32 %v2769_v50, %v330_v46  ;;  %v2847_v58 = vsel %vm337_vm7, %v320_v37, %v359_v47  ;;  %v322_v59 = vadd.f32 %v254_v39, %v2757_v43  ;;  %vm347_vm9 = vcmp.ge.f32.partialorder %v330_v46, 0.0 }
  0xea   :  { %506 = vrot.lane.b32.xlu0 %v408_v5, %s2533_s20  ;;  %v205_v12 = vcombine.high %v2792_v9, %v2792_v9  ;;  %v410_v18 = vmul.f32 %v2682_v16, %v2843_v56  ;;  %v235_v60 = vcombine.high %v219_v33, %v219_v33  ;;  %v2855_v62 = vsel %vm342_vm8, %v325_v40, %v364_v54  ;;  %v404_v33 = vld [vmem:[%s3588_s1 + $0x70] sm:$0xff] }
  0xeb   :  { %520 = vrot.lane.b32.xlu1 %v415_v55, %s2533_s20  ;;  %v407_v63 = vmul.f32 %v2642_v8, %v2847_v58  ;;  %v331_v0 = vadd.f32 %v290_v51, %v2757_v43  ;;  %v324_v1 = vadd.f32 %v262_v53, %v2757_v43  ;;  %v270_v2 = vrot.slane %v188_v52, %v2751_v38 }
  0xec   :  { %v2862_v3 = vsel %vm347_vm9, %v330_v46, %v369_v57  ;;  %v361_v4 = vmul.f32 %v2769_v50, %v322_v59  ;;  %vm339_vm10 = vcmp.ge.f32.partialorder %v322_v59, 0.0  ;;  %v412_v16 = vmul.f32 %v2700_v19, %v2855_v62 }
  0xed   :  { %v233_v8 = vrot.slane %v205_v12, %v2748_v35  ;;  %v298_v6 = vrot.slane %v235_v60, %v2751_v38  ;;  %v417_v9 = vmul.f32 %v2707_v20, %v2862_v3  ;;  %v370_v11 = vmul.f32 %v2769_v50, %v331_v0  ;;  %v402_v20 = vld [vmem:[%s3588_s1 + $0x60] sm:$0xff] }
  0xee   :  { %510 = vrot.lane.b32.xlu0 %v410_v18, %s2533_s20  ;;  %v363_v13 = vmul.f32 %v2769_v50, %v324_v1  ;;  %v326_v15 = vadd.f32 %v270_v2, %v2757_v43  ;;  %v2877_v17 = vsel %vm339_vm10, %v322_v59, %v361_v4  ;;  %vm348_vm11 = vcmp.ge.f32.partialorder %v331_v0, 0.0 }
  0xef   :  { %504 = vrot.lane.b32.xlu1 %v407_v63, %s2533_s20  ;;  %vm341_vm12 = vcmp.ge.f32.partialorder %v324_v1, 0.0  ;;  %v409_v19 = vmul.f32 %v2637_v7, %v2877_v17  ;;  %v2885_v35 = vsel %vm348_vm11, %v331_v0, %v370_v11  ;;  %v333_v21 = vadd.f32 %v298_v6, %v2757_v43 }
  0xf0   :  { %v294_v23 = vrot.slane %v233_v8, %v2751_v38  ;;  %v2889_v24 = vsel %vm341_vm12, %v324_v1, %v363_v13  ;;  %v365_v25 = vmul.f32 %v2769_v50, %v326_v15  ;;  %vm343_vm13 = vcmp.ge.f32.partialorder %v326_v15, 0.0 }
  0xf1   :  { %v418_v7 = vmul.f32 %v402_v20, %v2885_v35  ;;  %v411_v26 = vmul.f32 %v2652_v10, %v2889_v24  ;;  %v372_v27 = vmul.f32 %v2769_v50, %v333_v21  ;;  %v237_v28 = vcombine.high %v233_v8, %v233_v8 }
  0xf2   :  { %514 = vrot.lane.b32.xlu0 %v412_v16, %s2533_s20  ;;  %v2898_v29 = vsel %vm343_vm13, %v326_v15, %v365_v25  ;;  %vm350_vm14 = vcmp.ge.f32.partialorder %v333_v21, 0.0  ;;  %v332_v31 = vadd.f32 %v294_v23, %v2757_v43  ;;  %vm550_vm2 = vcmask 261120  }
  0xf3   :  { %524 = vrot.lane.b32.xlu1 %v417_v9, %s2533_s20  ;;  %v413_v32 = vmul.f32 %v2672_v14, %v2898_v29  ;;  %v2908_v10 = vsel %vm350_vm14, %v333_v21, %v372_v27  ;;  %v302_v36 = vrot.slane %v237_v28, %v2751_v38  ;;  %v403_v14 = vld [vmem:[%s3588_s1 + $0x68] sm:$0xff]  ;;  %vm602_vm3 = vcmask 785408  }
  0xf4   :  { %v371_v34 = vmul.f32 %v2769_v50, %v332_v31  ;;  %vm349_vm15 = vcmp.ge.f32.partialorder %v332_v31, 0.0  ;;  %v420_v37 = vmul.f32 %v404_v33, %v2908_v10  ;;  %vm1214_vm4 = vcmask 64512  }
  0xf5   :  { %v334_v40 = vadd.f32 %v302_v36, %v2757_v43  ;;  %v439_v43 = vpop.permute.xlu0 %438  ;;  %vm1334_vm6 = vcmask 7168   ;;  %vm1863_vm13 = vcmask 1041409   ;;  %vm1865_vm14 = vcmask 1042434  }
  0xf6   :  { %462 = vrot.lane.b32.xlu0 %v402_v20, %s2531_s21  ;;  %v2919_v39 = vsel %vm349_vm15, %v332_v31, %v371_v34  ;;  %v551_v63 = vsel %vm550_vm2, %v2821_v41, %v439_v43  ;;  %vm1867_vm15 = vcmask 1043459  }
  0xf7   :  { %508 = vrot.lane.b32.xlu1 %v409_v19, %s2533_s20  ;;  %v419_v22 = vmul.f32 %v403_v14, %v2919_v39  ;;  %v373_v38 = vmul.f32 %v2769_v50, %v334_v40  ;;  %vm351_vm1 = vcmp.ge.f32.partialorder %v334_v40, 0.0  ;;  %v445_v50 = vpop.permute.xlu1 %444 }
  0xf8   :  { %v554_v15 = vsel %vm550_vm2, %v2877_v17, %v445_v50 }
  0xf9   :  { %v2929_v45 = vsel %vm351_vm1, %v334_v40, %v373_v38  ;;  %v441_v47 = vpop.permute.xlu0 %440 }
  0xfa   :  { %526 = vrot.lane.b32.xlu0 %v418_v7, %s2533_s20  ;;  %v421_v46 = vmul.f32 %v405_v44, %v2929_v45  ;;  %v552_v16 = vsel %vm550_vm2, %v2847_v58, %v441_v47 }
  0xfb   :  { %512 = vrot.lane.b32.xlu1 %v411_v26, %s2533_s20  ;;  %v449_v5 = vpop.permute.xlu1 %448 }
  0xfc   :  { %v556_v23 = vsel %vm550_vm2, %v2889_v24, %v449_v5 }
  0xfd   :  { %v443_v48 = vpop.permute.xlu0 %442 }
  0xfe   :  { %466 = vrot.lane.b32.xlu0 %v404_v33, %s2531_s21  ;;  %v553_v6 = vsel %vm550_vm2, %v2834_v49, %v443_v48 }
  0xff   :  { %516 = vrot.lane.b32.xlu1 %v413_v32, %s2533_s20  ;;  %v453_v54 = vpop.permute.xlu1 %452 }
 0x100   :  { %v558_v27 = vsel %vm550_vm2, %v2898_v29, %v453_v54 }
 0x101   :  { %v447_v51 = vpop.permute.xlu0 %446 }
 0x102   :  { %530 = vrot.lane.b32.xlu0 %v420_v37, %s2533_s20  ;;  %v555_v58 = vsel %vm550_vm2, %v2843_v56, %v447_v51 }
 0x103   :  { %464 = vrot.lane.b32.xlu1 %v403_v14, %s2531_s21  ;;  %v457_v57 = vpop.permute.xlu1 %456 }
 0x104   :  { %v560_v32 = vsel %vm550_vm2, %v2825_v42, %v457_v57 }
 0x105   :  { %v451_v52 = vpop.permute.xlu0 %450 }
 0x106   :  { %v557_v17 = vsel %vm550_vm2, %v2855_v62, %v451_v52 }
 0x107   :  { %528 = vrot.lane.b32.xlu1 %v419_v22, %s2533_s20  ;;  %v461_v12 = vpop.permute.xlu1 %460 }
 0x108   :  { %v562_v37 = vsel %vm550_vm2, %v2862_v3, %v461_v12 }
 0x109   :  { %v455_v53 = vpop.permute.xlu0 %454 }
 0x10a   :  { %v559_v24 = vsel %vm550_vm2, %v2781_v61, %v455_v53 }
 0x10b   :  { %468 = vrot.lane.b32.xlu1 %v405_v44, %s2531_s21 }
 0x10d   :  { %v459_v55 = vpop.permute.xlu0 %458 }
 0x10e   :  { %v561_v34 = vsel %vm550_vm2, %v2809_v30, %v459_v55 }
 0x10f   :  { %532 = vrot.lane.b32.xlu1 %v421_v46, %s2533_s20 }
 0x154   :  { %v519_v59 = vpop.permute.xlu0 %518 }
 0x155   :  { %v575_v62 = vsel %vm56_vm0, %v559_v24, %v519_v59 }
 0x158   :  { %v523_v18 = vpop.permute.xlu0 %522 }
 0x159   :  { %v503_v60 = vpop.permute.xlu1 %502  ;;  %v577_v61 = vsel %vm56_vm0, %v561_v34, %v523_v18 }
 0x15a   :  { %v567_v0 = vsel %vm56_vm0, %v551_v63, %v503_v60 }
 0x15b   :  { %2240 = vmatprep.mubr.msk.f32.mxu1 %vm602_vm3, %v567_v0 }
 0x15c   :  { %v507_v1 = vpop.permute.xlu0 %506 }
 0x15d   :  { %v521_v2 = vpop.permute.xlu1 %520  ;;  %v569_v11 = vsel %vm56_vm0, %v553_v6, %v507_v1 }
 0x15e   :  { %v576_v29 = vsel %vm56_vm0, %v560_v32, %v521_v2 }
 0x160   :  { %v511_v4 = vpop.permute.xlu0 %510 }
 0x161   :  { %v505_v8 = vpop.permute.xlu1 %504  ;;  %v571_v21 = vsel %vm56_vm0, %v555_v58, %v511_v4 }
 0x162   :  { %v568_v9 = vsel %vm56_vm0, %v552_v16, %v505_v8 }
 0x163   :  { %2241 = vmatmul.mubr.msk.f32.vlgmr.msra.gmra.mxu1 %vm602_vm3, %v568_v9 }
 0x164   :  { %2243 = vmatprep.mubr.msk.f32.mxu1 %vm602_vm3, %v569_v11  ;;  %v515_v41 = vpop.permute.xlu0 %514 }
 0x165   :  { %v525_v13 = vpop.permute.xlu1 %524  ;;  %v573_v56 = vsel %vm56_vm0, %v557_v17, %v515_v41 }
 0x166   :  { %v578_v40 = vsel %vm56_vm0, %v562_v37, %v525_v13 }
 0x168   :  { %v463_v49 = vpop.permute.xlu0 %462 }
 0x169   :  { %v509_v19 = vpop.permute.xlu1 %508  ;;  %v563_v42 = vsel %vm550_vm2, %v2885_v35, %v463_v49 }
 0x16a   :  { %v570_v20 = vsel %vm56_vm0, %v554_v15, %v509_v19 }
 0x16b   :  { %2244 = vmatmul.mubr.msk.f32.gmra.mxu1 %vm602_vm3, %v570_v20 }
 0x16c   :  { %2246 = vmatprep.mubr.msk.f32.mxu1 %vm602_vm3, %v571_v21  ;;  %v527_v26 = vpop.permute.xlu0 %526 }
 0x16d   :  { %v513_v25 = vpop.permute.xlu1 %512  ;;  %v579_v30 = vsel %vm56_vm0, %v563_v42, %v527_v26 }
 0x16e   :  { %v572_v7 = vsel %vm56_vm0, %v556_v23, %v513_v25 }
 0x16f   :  { %2247 = vmatmul.mubr.msk.f32.gmra.mxu1 %vm602_vm3, %v572_v7 }
 0x170   :  { %2249 = vmatprep.mubr.msk.f32.mxu1 %vm602_vm3, %v573_v56  ;;  %v467_v36 = vpop.permute.xlu0 %466 }
 0x171   :  { %v517_v28 = vpop.permute.xlu1 %516  ;;  %v565_v3 = vsel %vm550_vm2, %v2908_v10, %v467_v36  ;;  %v893_v10 = vld [vmem:[%s3595_s8 + $0x8] sm:$0xff] }
 0x172   :  { %v574_v31 = vsel %vm56_vm0, %v558_v27, %v517_v28  ;;  %2264 = vmatprep.subr.mxu0 %v893_v10 }
 0x173   :  { %2250 = vmatmul.mubr.msk.f32.gmra.mxu1 %vm602_vm3, %v574_v31  ;;  %2265 = vmatpush3.msra.mxu0 %v893_v10 }
 0x174   :  { %2252 = vmatprep.mubr.msk.f32.mxu1 %vm602_vm3, %v575_v62  ;;  %v531_v22 = vpop.permute.xlu0 %530 }
 0x175   :  { %v465_v33 = vpop.permute.xlu1 %464  ;;  %v581_v43 = vsel %vm56_vm0, %v565_v3, %v531_v22 }
 0x176   :  { %v564_v38 = vsel %vm550_vm2, %v2919_v39, %v465_v33  ;;  %v892_v39 = vld [vmem:[%s3595_s8] sm:$0xff] }
 0x177   :  { %2253 = vmatmul.mubr.msk.f32.gmra.mxu1 %vm602_vm3, %v576_v29  ;;  %2266 = vmatprep.subr.mxu0 %v892_v39 }
 0x178   :  { %2255 = vmatprep.mubr.msk.f32.mxu1 %vm602_vm3, %v577_v61  ;;  %2267 = vmatpush3.msra.mxu0 %v892_v39 }
 0x179   :  { %v529_v14 = vpop.permute.xlu1 %528 }
 0x17a   :  { %v580_v46 = vsel %vm56_vm0, %v564_v38, %v529_v14 }
 0x17b   :  { %2256 = vmatmul.mubr.msk.f32.gmra.mxu1 %vm602_vm3, %v578_v40 }
 0x17c   :  { %2258 = vmatprep.mubr.msk.f32.mxu1 %vm602_vm3, %v579_v30 }
 0x17d   :  { %v469_v44 = vpop.permute.xlu1 %468 }
 0x17e   :  { %v566_v35 = vsel %vm550_vm2, %v2929_v45, %v469_v44  ;;  %v3007_v45 = vld [vmem:[%s3594_s7] ss:$0 sm:$0xff] }
 0x17f   :  { %2259 = vmatmul.mubr.msk.f32.gmra.mxu1 %vm602_vm3, %v580_v46 }
 0x180   :  { %2261 = vmatprep.mubr.msk.f32.mxu1 %vm602_vm3, %v581_v43 }
 0x181   :  { %v533_v47 = vpop.permute.xlu1 %532 }
 0x182   :  { %v582_v48 = vsel %vm56_vm0, %v566_v35, %v533_v47  ;;  %vm901_vm0 = vcmask 130048  }
 0x183   :  { %2262 = vmatmul.mubr.msk.f32.gmra.mxu1 %vm602_vm3, %v582_v48 }
 0x223   :  { %v2242_v51 = vpop.f32.mrf.mxu1 }
 0x224   :  { %v723_v50 = vadd.f32 %v2242_v51, %v3007_v45 }
 0x225   :  { %v717_v52 = vpop.f32.mrf.mxu1 }
 0x226   :  { %v2091_v5 = vmul.f32 -1.442695, %v723_v50  ;;  %v718_v53 = vadd.f32 %v3007_v45, %v717_v52 }
 0x228   :  { %2301 = vpow2.f32 %v2091_v5  ;;  %v2090_v54 = vmul.f32 -1.442695, %v718_v53 }
 0x22a   :  { %2303 = vpow2.f32 %v2090_v54 }
 0x22b   :  { %v2245_v55 = vpop.f32.mrf.mxu1 }
 0x22c   :  { %v733_v57 = vadd.f32 %v2245_v55, %v3007_v45 }
 0x22d   :  { %v727_v59 = vpop.f32.mrf.mxu1 }
 0x22e   :  { %v2093_v12 = vmul.f32 -1.442695, %v733_v57  ;;  %v728_v18 = vadd.f32 %v3007_v45, %v727_v59 }
 0x22f   :  { %v2248_v60 = vpop.f32.mrf.mxu1 }
 0x230   :  { %2305 = vpow2.f32 %v2093_v12  ;;  %v2092_v63 = vmul.f32 -1.442695, %v728_v18  ;;  %v743_v0 = vadd.f32 %v2248_v60, %v3007_v45 }
 0x231   :  { %v737_v1 = vpop.f32.mrf.mxu1 }
 0x232   :  { %2307 = vpow2.f32 %v2092_v63  ;;  %v2095_v2 = vmul.f32 -1.442695, %v743_v0  ;;  %v738_v4 = vadd.f32 %v3007_v45, %v737_v1 }
 0x233   :  { %v2251_v16 = vpop.f32.mrf.mxu1 }
 0x234   :  { %2309 = vpow2.f32 %v2095_v2  ;;  %v2094_v8 = vmul.f32 -1.442695, %v738_v4  ;;  %v753_v6 = vadd.f32 %v2251_v16, %v3007_v45 }
 0x235   :  { %v2302_v9 = vpop.eup %2301  ;;  %v747_v11 = vpop.f32.mrf.mxu1 }
 0x236   :  { %v845_v41 = vadd.f32 1.0, %v2302_v9  ;;  %2311 = vpow2.f32 %v2094_v8  ;;  %v2097_v13 = vmul.f32 -1.442695, %v753_v6  ;;  %v748_v15 = vadd.f32 %v3007_v45, %v747_v11 }
 0x237   :  { %v2304_v19 = vpop.eup %2303  ;;  %v2254_v58 = vpop.f32.mrf.mxu1 }
 0x238   :  { %2313 = vrcp.f32 %v845_v41  ;;  %v844_v20 = vadd.f32 1.0, %v2304_v19  ;;  %v2096_v49 = vmul.f32 -1.442695, %v748_v15  ;;  %v763_v21 = vadd.f32 %v2254_v58, %v3007_v45 }
 0x239   :  { %2315 = vpow2.f32 %v2097_v13  ;;  %v757_v23 = vpop.f32.mrf.mxu1 }
 0x23a   :  { %2317 = vrcp.f32 %v844_v20  ;;  %v2099_v25 = vmul.f32 -1.442695, %v763_v21  ;;  %v758_v17 = vadd.f32 %v3007_v45, %v757_v23 }
 0x23b   :  { %2319 = vpow2.f32 %v2096_v49  ;;  %v2257_v7 = vpop.f32.mrf.mxu1 }
 0x23c   :  { %2321 = vpow2.f32 %v2099_v25  ;;  %v2098_v56 = vmul.f32 -1.442695, %v758_v17  ;;  %v773_v26 = vadd.f32 %v2257_v7, %v3007_v45  ;;  %v3044_v17 = vld [vmem:[%s3596_s9] ss:$0 sm:$0xff] }
 0x23d   :  { %v2306_v27 = vpop.eup %2305  ;;  %v767_v28 = vpop.f32.mrf.mxu1 }
 0x23e   :  { %v847_v24 = vadd.f32 1.0, %v2306_v27  ;;  %2323 = vpow2.f32 %v2098_v56  ;;  %v2101_v31 = vmul.f32 -1.442695, %v773_v26  ;;  %v768_v62 = vadd.f32 %v3007_v45, %v767_v28 }
 0x23f   :  { %v2308_v32 = vpop.eup %2307  ;;  %v2260_v33 = vpop.f32.mrf.mxu1 }
 0x240   :  { %2325 = vrcp.f32 %v847_v24  ;;  %v846_v34 = vadd.f32 1.0, %v2308_v32  ;;  %v2100_v29 = vmul.f32 -1.442695, %v768_v62  ;;  %v783_v36 = vadd.f32 %v2260_v33, %v3007_v45 }
 0x241   :  { %v2310_v61 = vpop.eup %2309  ;;  %2327 = vpow2.f32 %v2101_v31  ;;  %v777_v37 = vpop.f32.mrf.mxu1 }
 0x242   :  { %2329 = vrcp.f32 %v846_v34  ;;  %v849_v14 = vadd.f32 1.0, %v2310_v61  ;;  %v2103_v40 = vmul.f32 -1.442695, %v783_v36  ;;  %v778_v42 = vadd.f32 %v3007_v45, %v777_v37 }
 0x243   :  { %v2312_v30 = vpop.eup %2311  ;;  %2331 = vpow2.f32 %v2100_v29  ;;  %v2263_v22 = vpop.f32.mrf.mxu1 }
 0x244   :  { %2333 = vrcp.f32 %v849_v14  ;;  %v848_v38 = vadd.f32 1.0, %v2312_v30  ;;  %v2102_v44 = vmul.f32 -1.442695, %v778_v42  ;;  %v793_v3 = vadd.f32 %v2263_v22, %v3007_v45 }
 0x245   :  { %v2314_v46 = vpop.eup %2313  ;;  %2335 = vpow2.f32 %v2103_v40  ;;  %v787_v43 = vpop.f32.mrf.mxu1 }
 0x246   :  { %v2316_v35 = vpop.eup %2315  ;;  %2337 = vrcp.f32 %v848_v38  ;;  %v2105_v47 = vmul.f32 -1.442695, %v793_v3  ;;  %v788_v48 = vadd.f32 %v3007_v45, %v787_v43 }
 0x247   :  { %v2318_v10 = vpop.eup %2317  ;;  %2339 = vpow2.f32 %v2102_v44  ;;  %v851_v51 = vadd.f32 1.0, %v2316_v35 }
 0x248   :  { %v2320_v39 = vpop.eup %2319  ;;  %2341 = vpow2.f32 %v2105_v47  ;;  %v2104_v50 = vmul.f32 -1.442695, %v788_v48  ;;  %2268 = vmatprep.mubr.msk.f32.mxu0 %vm901_vm0, %v2318_v10 }
 0x249   :  { %v2322_v52 = vpop.eup %2321  ;;  %v850_v5 = vadd.f32 1.0, %v2320_v39  ;;  %2269 = vmatmul.mubr.msk.f32.vlgmr.msra.gmra.mxu0 %vm901_vm0, %v2314_v46 }
 0x24a   :  { %2343 = vpow2.f32 %v2104_v50  ;;  %v853_v54 = vadd.f32 1.0, %v2322_v52 }
 0x24b   :  { %v2324_v53 = vpop.eup %2323  ;;  %2345 = vrcp.f32 %v850_v5 }
 0x24c   :  { %2347 = vrcp.f32 %v851_v51  ;;  %v852_v55 = vadd.f32 1.0, %v2324_v53 }
 0x24d   :  { %v2326_v57 = vpop.eup %2325 }
 0x24e   :  { %v2328_v45 = vpop.eup %2327  ;;  %2349 = vrcp.f32 %v852_v55 }
 0x24f   :  { %v2330_v59 = vpop.eup %2329  ;;  %2351 = vrcp.f32 %v853_v54  ;;  %v855_v18 = vadd.f32 1.0, %v2328_v45 }
 0x250   :  { %v2332_v12 = vpop.eup %2331  ;;  %2271 = vmatprep.mubr.msk.f32.mxu0 %vm901_vm0, %v2330_v59 }
 0x251   :  { %v2334_v60 = vpop.eup %2333  ;;  %v854_v63 = vadd.f32 1.0, %v2332_v12  ;;  %2272 = vmatmul.mubr.msk.f32.gmra.mxu0 %vm901_vm0, %v2326_v57 }
 0x252   :  { %v2336_v0 = vpop.eup %2335 }
 0x253   :  { %v2338_v1 = vpop.eup %2337  ;;  %2353 = vrcp.f32 %v854_v63  ;;  %v857_v4 = vadd.f32 1.0, %v2336_v0 }
 0x254   :  { %v2340_v2 = vpop.eup %2339  ;;  %2355 = vrcp.f32 %v855_v18  ;;  %2274 = vmatprep.mubr.msk.f32.mxu0 %vm901_vm0, %v2338_v1 }
 0x255   :  { %v2342_v16 = vpop.eup %2341  ;;  %v856_v8 = vadd.f32 1.0, %v2340_v2  ;;  %2275 = vmatmul.mubr.msk.f32.gmra.mxu0 %vm901_vm0, %v2334_v60 }
 0x256   :  { %v859_v11 = vadd.f32 1.0, %v2342_v16 }
 0x257   :  { %v2344_v6 = vpop.eup %2343  ;;  %2357 = vrcp.f32 %v856_v8 }
 0x258   :  { %v2346_v9 = vpop.eup %2345  ;;  %2359 = vrcp.f32 %v857_v4  ;;  %v858_v41 = vadd.f32 1.0, %v2344_v6 }
 0x259   :  { %v2348_v13 = vpop.eup %2347  ;;  %2277 = vmatprep.mubr.msk.f32.mxu0 %vm901_vm0, %v2346_v9 }
 0x25a   :  { %2361 = vrcp.f32 %v858_v41  ;;  %2278 = vmatmul.mubr.msk.f32.gmra.mxu0 %vm901_vm0, %v2348_v13 }
 0x25b   :  { %v2350_v15 = vpop.eup %2349  ;;  %2363 = vrcp.f32 %v859_v11  ;;  %v3063_v11 = vld [vmem:[%s3597_s10] ss:$0 sm:$0xff] }
 0x25c   :  { %2280 = vmatprep.mubr.msk.f32.mxu0 %vm901_vm0, %v2350_v15  ;;  %v2352_v19 = vpop.eup %2351 }
 0x25e   :  { %2281 = vmatmul.mubr.msk.f32.gmra.mxu0 %vm901_vm0, %v2352_v19 }
 0x260   :  { %v2354_v58 = vpop.eup %2353 }
 0x261   :  { %v2356_v20 = vpop.eup %2355  ;;  %2283 = vmatprep.mubr.msk.f32.mxu0 %vm901_vm0, %v2354_v58 }
 0x262   :  { %2284 = vmatmul.mubr.msk.f32.gmra.mxu0 %vm901_vm0, %v2356_v20 }
 0x264   :  { %v2358_v49 = vpop.eup %2357 }
 0x265   :  { %v2360_v21 = vpop.eup %2359  ;;  %2286 = vmatprep.mubr.msk.f32.mxu0 %vm901_vm0, %v2358_v49 }
 0x266   :  { %2287 = vmatmul.mubr.msk.f32.gmra.mxu0 %vm901_vm0, %v2360_v21 }
 0x267   :  { %v2362_v23 = vpop.eup %2361 }
 0x268   :  { %2289 = vmatprep.mubr.msk.f32.mxu0 %vm901_vm0, %v2362_v23  ;;  %v2364_v25 = vpop.eup %2363 }
 0x26a   :  { %2290 = vmatmul.mubr.msk.f32.gmra.mxu0 %vm901_vm0, %v2364_v25 }
 0x309   :  { %v2270_v7 = vpop.f32.mrf.mxu0 }
 0x30a   :  { %v1022_v56 = vadd.f32 %v2270_v7, %v3044_v17 }
 0x30b   :  { %v1016_v26 = vpop.f32.mrf.mxu0 }
 0x30c   :  { %v2124_v27 = vmul.f32 -1.442695, %v1022_v56  ;;  %v1017_v28 = vadd.f32 %v3044_v17, %v1016_v26 }
 0x30e   :  { %2365 = vpow2.f32 %v2124_v27  ;;  %v2123_v24 = vmul.f32 -1.442695, %v1017_v28 }
 0x310   :  { %2367 = vpow2.f32 %v2123_v24 }
 0x311   :  { %v2273_v31 = vpop.f32.mrf.mxu0 }
 0x312   :  { %v1032_v62 = vadd.f32 %v2273_v31, %v3044_v17 }
 0x313   :  { %v1026_v32 = vpop.f32.mrf.mxu0 }
 0x314   :  { %v2126_v33 = vmul.f32 -1.442695, %v1032_v62  ;;  %v1027_v34 = vadd.f32 %v3044_v17, %v1026_v32 }
 0x315   :  { %v2276_v29 = vpop.f32.mrf.mxu0 }
 0x316   :  { %2369 = vpow2.f32 %v2126_v33  ;;  %v2125_v36 = vmul.f32 -1.442695, %v1027_v34  ;;  %v1042_v61 = vadd.f32 %v2276_v29, %v3044_v17 }
 0x317   :  { %v1036_v37 = vpop.f32.mrf.mxu0 }
 0x318   :  { %2371 = vpow2.f32 %v2125_v36  ;;  %v2128_v14 = vmul.f32 -1.442695, %v1042_v61  ;;  %v1037_v40 = vadd.f32 %v3044_v17, %v1036_v37 }
 0x31a   :  { %2373 = vpow2.f32 %v2128_v14  ;;  %v2127_v42 = vmul.f32 -1.442695, %v1037_v40  ;;  %v2279_v30 = vpop.f32.mrf.mxu0 }
 0x31b   :  { %v2366_v22 = vpop.eup %2365  ;;  %v1052_v38 = vadd.f32 %v2279_v30, %v3044_v17 }
 0x31c   :  { %v1144_v44 = vadd.f32 1.0, %v2366_v22  ;;  %2375 = vpow2.f32 %v2127_v42  ;;  %v1046_v3 = vpop.f32.mrf.mxu0 }
 0x31d   :  { %v2368_v46 = vpop.eup %2367  ;;  %v2130_v43 = vmul.f32 -1.442695, %v1052_v38  ;;  %v1047_v35 = vadd.f32 %v3044_v17, %v1046_v3 }
 0x31e   :  { %2377 = vrcp.f32 %v1144_v44  ;;  %v1143_v47 = vadd.f32 1.0, %v2368_v46  ;;  %v2282_v48 = vpop.f32.mrf.mxu0 }
 0x31f   :  { %2379 = vpow2.f32 %v2130_v43  ;;  %v2129_v10 = vmul.f32 -1.442695, %v1047_v35  ;;  %v1062_v39 = vadd.f32 %v2282_v48, %v3044_v17 }
 0x320   :  { %2381 = vrcp.f32 %v1143_v47  ;;  %v1056_v51 = vpop.f32.mrf.mxu0 }
 0x321   :  { %2383 = vpow2.f32 %v2129_v10  ;;  %v2132_v50 = vmul.f32 -1.442695, %v1062_v39  ;;  %v1057_v52 = vadd.f32 %v3044_v17, %v1056_v51 }
 0x322   :  { %v2285_v5 = vpop.f32.mrf.mxu0 }
 0x323   :  { %v2370_v53 = vpop.eup %2369  ;;  %2385 = vpow2.f32 %v2132_v50  ;;  %v2131_v54 = vmul.f32 -1.442695, %v1057_v52  ;;  %v1072_v55 = vadd.f32 %v2285_v5, %v3044_v17 }
 0x324   :  { %v1146_v57 = vadd.f32 1.0, %v2370_v53  ;;  %v1066_v45 = vpop.f32.mrf.mxu0 }
 0x325   :  { %v2372_v59 = vpop.eup %2371  ;;  %2387 = vpow2.f32 %v2131_v54  ;;  %v2134_v12 = vmul.f32 -1.442695, %v1072_v55  ;;  %v1067_v18 = vadd.f32 %v3044_v17, %v1066_v45 }
 0x326   :  { %2389 = vrcp.f32 %v1146_v57  ;;  %v1145_v60 = vadd.f32 1.0, %v2372_v59  ;;  %v2288_v63 = vpop.f32.mrf.mxu0 }
 0x327   :  { %v2374_v0 = vpop.eup %2373  ;;  %2391 = vpow2.f32 %v2134_v12  ;;  %v2133_v1 = vmul.f32 -1.442695, %v1067_v18  ;;  %v1082_v2 = vadd.f32 %v2288_v63, %v3044_v17 }
 0x328   :  { %2393 = vrcp.f32 %v1145_v60  ;;  %v1148_v4 = vadd.f32 1.0, %v2374_v0  ;;  %v1076_v16 = vpop.f32.mrf.mxu0 }
 0x329   :  { %v2376_v8 = vpop.eup %2375  ;;  %2395 = vpow2.f32 %v2133_v1  ;;  %v2136_v6 = vmul.f32 -1.442695, %v1082_v2  ;;  %v1077_v9 = vadd.f32 %v3044_v17, %v1076_v16 }
 0x32a   :  { %2397 = vrcp.f32 %v1148_v4  ;;  %v1147_v41 = vadd.f32 1.0, %v2376_v8  ;;  %v2291_v13 = vpop.f32.mrf.mxu0 }
 0x32b   :  { %v2378_v15 = vpop.eup %2377  ;;  %2399 = vpow2.f32 %v2136_v6  ;;  %v2135_v19 = vmul.f32 -1.442695, %v1077_v9  ;;  %v1092_v7 = vadd.f32 %v2291_v13, %v3044_v17 }
 0x32c   :  { %v2380_v58 = vpop.eup %2379  ;;  %v1086_v20 = vpop.f32.mrf.mxu0  ;;  %v1199_v49 = vmul.f32 %v2378_v15, %v3063_v11  ;;  %2401 = vrcp.f32 %v1147_v41 }
 0x32d   :  { %v2382_v21 = vpop.eup %2381  ;;  %v1087_v23 = vadd.f32 %v3044_v17, %v1086_v20  ;;  %2403 = vpow2.f32 %v2135_v19  ;;  %v1150_v31 = vadd.f32 1.0, %v2380_v58  ;;  %v2138_v34 = vmul.f32 -1.442695, %v1092_v7 }
 0x32e   :  { %v2384_v25 = vpop.eup %2383  ;;  %v1218_v56 = vsel %vm1214_vm4, %v1199_v49, 0.0  ;;  %v1198_v26 = vmul.f32 %v2382_v21, %v3063_v11 }
 0x32f   :  { %v1149_v27 = vadd.f32 1.0, %v2384_v25  ;;  %v2137_v28 = vmul.f32 -1.442695, %v1087_v23  ;;  %1219 = vadd.xlane.f32.xlu1 %v1218_v56 }
 0x330   :  { %v2386_v24 = vpop.eup %2385  ;;  %v1215_v62 = vsel %vm1214_vm4, %v1198_v26, 0.0 }
 0x331   :  { %2405 = vrcp.f32 %v1149_v27  ;;  %v1152_v32 = vadd.f32 1.0, %v2386_v24  ;;  %1216 = vadd.xlane.f32.xlu0 %v1215_v62  ;;  %v2534_v27 = vmov 0   ;;  %v3102_v24 = vld [vmem:[#allocation2] ss:$0 sm:$0xff] }
 0x332   :  { %v2388_v33 = vpop.eup %2387  ;;  %2407 = vpow2.f32 %v2137_v28  ;;  %2299 = vset.pattern.permute.xlu0 %v2534_v27  ;;  %2300 = vset.pattern.permute.xlu1 %v2534_v27  ;;  %v1287_v28 = vld [vmem:[%s3589_s2 + $0x8] sm:$0xff] }
 0x333   :  { %v2390_v29 = vpop.eup %2389  ;;  %2409 = vrcp.f32 %v1152_v32  ;;  %v1151_v17 = vadd.f32 1.0, %v2388_v33  ;;  %vm1303_vm5 = vcmp.eq.f32.partialorder %v1287_v28, 0.0 }
 0x334   :  { %v2392_v36 = vpop.eup %2391  ;;  %2411 = vrcp.f32 %v1150_v31  ;;  %v1201_v61 = vmul.f32 %v2390_v29, %v3063_v11  ;;  %v1286_v31 = vld [vmem:[%s3589_s2] sm:$0xff] }
 0x335   :  { %v2394_v37 = vpop.eup %2393  ;;  %2413 = vrcp.f32 %v1151_v17  ;;  %v1154_v14 = vadd.f32 1.0, %v2392_v36  ;;  %vm1302_vm7 = vcmp.eq.f32.partialorder %v1286_v31, 0.0 }
 0x336   :  { %v2396_v40 = vpop.eup %2395  ;;  %2415 = vpow2.f32 %v2138_v34  ;;  %v1224_v42 = vsel %vm1214_vm4, %v1201_v61, 0.0  ;;  %v1200_v30 = vmul.f32 %v2394_v37, %v3063_v11 }
 0x337   :  { %v2398_v22 = vpop.eup %2397  ;;  %2417 = vrcp.f32 %v1154_v14  ;;  %v1153_v38 = vadd.f32 1.0, %v2396_v40  ;;  %1225 = vadd.xlane.f32.xlu1 %v1224_v42  ;;  %v1289_v42 = vld [vmem:[%s3589_s2 + $0x18] sm:$0xff] }
 0x338   :  { %v2400_v44 = vpop.eup %2399  ;;  %v1221_v3 = vsel %vm1214_vm4, %v1200_v30, 0.0  ;;  %v1203_v46 = vmul.f32 %v2398_v22, %v3063_v11  ;;  %vm1305_vm8 = vcmp.eq.f32.partialorder %v1289_v42, 0.0 }
 0x339   :  { %v2402_v43 = vpop.eup %2401  ;;  %2419 = vrcp.f32 %v1153_v38  ;;  %v1156_v35 = vadd.f32 1.0, %v2400_v44 }
 0x33a   :  { %v2404_v47 = vpop.eup %2403  ;;  %v1230_v10 = vsel %vm1214_vm4, %v1203_v46, 0.0  ;;  %v1202_v39 = vmul.f32 %v2402_v43, %v3063_v11 }
 0x33b   :  { %1222 = vadd.xlane.f32.xlu1 %v1221_v3  ;;  %2421 = vrcp.f32 %v1156_v35  ;;  %v1155_v50 = vadd.f32 1.0, %v2404_v47 }
 0x33c   :  { %v1227_v55 = vsel %vm1214_vm4, %v1202_v39, 0.0 }
 0x33d   :  { %2423 = vrcp.f32 %v1155_v50 }
 0x33e   :  { %v2406_v48 = vpop.eup %2405 }
 0x33f   :  { %v2408_v51 = vpop.eup %2407  ;;  %1231 = vadd.xlane.f32.xlu1 %v1230_v10  ;;  %v1204_v57 = vmul.f32 %v2406_v48, %v3063_v11 }
 0x340   :  { %v2410_v52 = vpop.eup %2409  ;;  %v1157_v59 = vadd.f32 1.0, %v2408_v51  ;;  %v1288_v51 = vld [vmem:[%s3589_s2 + $0x10] sm:$0xff] }
 0x341   :  { %v2412_v5 = vpop.eup %2411  ;;  %v1207_v53 = vmul.f32 %v2410_v52, %v3063_v11  ;;  %v1233_v63 = vsel %vm1214_vm4, %v1204_v57, 0.0  ;;  %vm1304_vm9 = vcmp.eq.f32.partialorder %v1288_v51, 0.0 }
 0x342   :  { %v2414_v54 = vpop.eup %2413  ;;  %v1205_v0 = vmul.f32 %v2412_v5, %v3063_v11  ;;  %2425 = vrcp.f32 %v1157_v59 }
 0x343   :  { %v2416_v45 = vpop.eup %2415  ;;  %1228 = vadd.xlane.f32.xlu1 %v1227_v55  ;;  %v1242_v12 = vsel %vm1214_vm4, %v1207_v53, 0.0  ;;  %v1206_v18 = vmul.f32 %v2414_v54, %v3063_v11  ;;  %v1291_v54 = vld [vmem:[%s3589_s2 + $0x28] sm:$0xff] }
 0x344   :  { %v2418_v60 = vpop.eup %2417  ;;  %1243 = vadd.xlane.f32.xlu0 %v1242_v12  ;;  %v1158_v1 = vadd.f32 1.0, %v2416_v45  ;;  %v1236_v8 = vsel %vm1214_vm4, %v1205_v0, 0.0  ;;  %vm1307_vm10 = vcmp.eq.f32.partialorder %v1291_v54, 0.0 }
 0x345   :  { %v1239_v2 = vsel %vm1214_vm4, %v1206_v18, 0.0  ;;  %v1209_v4 = vmul.f32 %v2418_v60, %v3063_v11  ;;  %v3128_v18 = vld [vmem:[%s3589_s2 + $0x48] sm:$0xff] }
 0x346   :  { %v2420_v16 = vpop.eup %2419  ;;  %2427 = vrcp.f32 %v1158_v1  ;;  %v3137_v1 = vld [vmem:[%s3589_s2 + $0x20] sm:$0xff]  ;;  %vm1311_vm11 = vcmp.eq.f32.partialorder %v3128_v18, 0.0 }
 0x347   :  { %1234 = vadd.xlane.f32.xlu1 %v1233_v63  ;;  %v1248_v6 = vsel %vm1214_vm4, %v1209_v4, 0.0  ;;  %v1208_v9 = vmul.f32 %v2420_v16, %v3063_v11  ;;  %vm1306_vm12 = vcmp.eq.f32.partialorder %v3137_v1, 0.0 }
 0x348   :  { %1240 = vadd.xlane.f32.xlu0 %v1239_v2  ;;  %v2422_v41 = vpop.eup %2421 }
 0x349   :  { %v1245_v13 = vsel %vm1214_vm4, %v1208_v9, 0.0  ;;  %v1211_v15 = vmul.f32 %v2422_v41, %v3063_v11 }
 0x34a   :  { %v2424_v19 = vpop.eup %2423 }
 0x34b   :  { %1237 = vadd.xlane.f32.xlu1 %v1236_v8  ;;  %v1254_v58 = vsel %vm1214_vm4, %v1211_v15, 0.0  ;;  %v1210_v20 = vmul.f32 %v2424_v19, %v3063_v11 }
 0x34c   :  { %1249 = vadd.xlane.f32.xlu0 %v1248_v6 }
 0x34d   :  { %v1251_v21 = vsel %vm1214_vm4, %v1210_v20, 0.0 }
 0x34f   :  { %v2426_v49 = vpop.eup %2425 }
 0x350   :  { %1246 = vadd.xlane.f32.xlu0 %v1245_v13  ;;  %v1212_v23 = vmul.f32 %v2426_v49, %v3063_v11 }
 0x352   :  { %v1257_v7 = vsel %vm1214_vm4, %v1212_v23, 0.0 }
 0x353   :  { %v2428_v25 = vpop.eup %2427 }
 0x354   :  { %1255 = vadd.xlane.f32.xlu0 %v1254_v58  ;;  %v1213_v56 = vmul.f32 %v2428_v25, %v3063_v11 }
 0x356   :  { %v1260_v26 = vsel %vm1214_vm4, %v1213_v56, 0.0  ;;  %vm1869_vm4 = vcmask 1044484  }
 0x358   :  { %1252 = vadd.xlane.f32.xlu0 %v1251_v21 }
 0x35c   :  { %1258 = vadd.xlane.f32.xlu0 %v1257_v7 }
 0x360   :  { %1261 = vadd.xlane.f32.xlu0 %v1260_v26 }
 0x3b8   :  { %v1220_v62 = vpop.xlane.xlu1 %1219 }
 0x3b9   :  { %v1271_v11 = vadd.f32 %v3102_v24, %v1220_v62 }
 0x3ba   :  { %v1217_v32 = vpop.xlane.xlu0 %1216 }
 0x3bb   :  { %v1319_v33 = vsel %vm1303_vm5, -1e+09, %v1271_v11  ;;  %v1889_v34 = vsel %vm1303_vm5, 0.0, %v1271_v11  ;;  %v1270_v29 = vadd.f32 %v3102_v24, %v1217_v32  ;;  %vm1871_vm5 = vcmask 1045509  }
 0x3bc   :  { %v1342_v17 = vsel %vm1334_vm6, %v1319_v33, -inf  ;;  %v1911_v36 = vsel %vm1334_vm6, %v1889_v34, 0.0 }
 0x3bd   :  { %v1343_v61 = vrot.slane %v1342_v17, 4  ;;  %v1912_v37 = vrot.slane %v1911_v36, 4  ;;  %v1318_v14 = vsel %vm1302_vm7, -1e+09, %v1270_v29  ;;  %v1888_v40 = vsel %vm1302_vm7, 0.0, %v1270_v29 }
 0x3be   :  { %v1335_v30 = vsel %vm1334_vm6, %v1318_v14, -inf  ;;  %v1904_v22 = vsel %vm1334_vm6, %v1888_v40, 0.0 }
 0x3bf   :  { %v1344_v38 = vmax.f32 %v1342_v17, %v1343_v61  ;;  %v1913_v44 = vadd.f32 %v1912_v37, %v1911_v36  ;;  %v1336_v3 = vrot.slane %v1335_v30, 4  ;;  %v1905_v46 = vrot.slane %v1904_v22, 4 }
 0x3c0   :  { %v1226_v43 = vpop.xlane.xlu1 %1225 }
 0x3c1   :  { %v1345_v35 = vrot.slane %v1344_v38, 2  ;;  %v1914_v47 = vrot.slane %v1913_v44, 2  ;;  %v1337_v48 = vmax.f32 %v1335_v30, %v1336_v3  ;;  %v1906_v10 = vadd.f32 %v1905_v46, %v1904_v22 }
 0x3c2   :  { %v1273_v39 = vadd.f32 %v3102_v24, %v1226_v43 }
 0x3c3   :  { %v1346_v50 = vmax.f32 %v1344_v38, %v1345_v35  ;;  %v1915_v52 = vadd.f32 %v1914_v47, %v1913_v44  ;;  %v1338_v5 = vrot.slane %v1337_v48, 2  ;;  %v1907_v53 = vrot.slane %v1906_v10, 2 }
 0x3c4   :  { %v3123_v55 = vsel %vm1305_vm8, -1e+09, %v1273_v39  ;;  %v1891_v57 = vsel %vm1305_vm8, 0.0, %v1273_v39  ;;  %v1223_v45 = vpop.xlane.xlu1 %1222  ;;  %vm1873_vm8 = vcmask 1046534  }
 0x3c5   :  { %v1347_v59 = vrot.slane %v1346_v50, 1  ;;  %v1339_v12 = vmax.f32 %v1337_v48, %v1338_v5  ;;  %v1356_v60 = vsel %vm1334_vm6, %v3123_v55, -inf  ;;  %v1925_v63 = vsel %vm1334_vm6, %v1891_v57, 0.0 }
 0x3c6   :  { %v1272_v0 = vadd.f32 %v3102_v24, %v1223_v45  ;;  %v1916_v4 = vrot.slane %v1915_v52, 1  ;;  %v1908_v8 = vadd.f32 %v1907_v53, %v1906_v10  ;;  %v1357_v6 = vrot.slane %v1356_v60, 4 }
 0x3c7   :  { %v1348_v2 = vmax.f32 %v1346_v50, %v1347_v59  ;;  %v1340_v16 = vrot.slane %v1339_v12, 1  ;;  %v1926_v9 = vrot.slane %v1925_v63, 4 }
 0x3c8   :  { %v3139_v41 = vsel %vm1304_vm9, -1e+09, %v1272_v0  ;;  %v1890_v13 = vsel %vm1304_vm9, 0.0, %v1272_v0  ;;  %v1232_v15 = vpop.xlane.xlu1 %1231  ;;  %v1358_v49 = vmax.f32 %v1356_v60, %v1357_v6  ;;  %v1917_v56 = vadd.f32 %v1916_v4, %v1915_v52 }
 0x3c9   :  { %v1448_v19 = vsub.f32 %v1319_v33, %v1348_v2  ;;  %v1341_v58 = vmax.f32 %v1339_v12, %v1340_v16  ;;  %v1349_v20 = vsel %vm1334_vm6, %v3139_v41, -inf  ;;  %v1927_v21 = vadd.f32 %v1926_v9, %v1925_v63 }
 0x3ca   :  { %v1350_v23 = vrot.slane %v1349_v20, 4  ;;  %v1918_v25 = vsel %vm1334_vm6, %v1890_v13, 0.0  ;;  %v1909_v28 = vrot.slane %v1908_v8, 1  ;;  %v1359_v31 = vrot.slane %v1358_v49, 2 }
 0x3cb   :  { %v1465_v7 = vmul.f32 1.442695, %v1448_v19  ;;  %v1447_v26 = vsub.f32 %v1318_v14, %v1341_v58  ;;  %v1919_v27 = vrot.slane %v1918_v25, 4  ;;  %v1275_v11 = vadd.f32 %v3102_v24, %v1232_v15 }
 0x3cc   :  { %v1351_v62 = vmax.f32 %v1349_v20, %v1350_v23  ;;  %v1229_v32 = vpop.xlane.xlu1 %1228  ;;  %v1928_v34 = vrot.slane %v1927_v21, 2  ;;  %v1360_v17 = vmax.f32 %v1358_v49, %v1359_v31  ;;  %v1910_v22 = vadd.f32 %v1909_v28, %v1908_v8 }
 0x3cd   :  { %2429 = vpow2.f32 %v1465_v7  ;;  %v1463_v33 = vmul.f32 1.442695, %v1447_v26  ;;  %v1920_v29 = vadd.f32 %v1919_v27, %v1918_v25  ;;  %v3148_v61 = vsel %vm1307_vm10, -1e+09, %v1275_v11  ;;  %v1244_v37 = vpop.xlane.xlu0 %1243  ;;  %v1294_v26 = vld [vmem:[%s3589_s2 + $0x40] sm:$0xff] }
 0x3ce   :  { %v1352_v36 = vrot.slane %v1351_v62, 2  ;;  %v1274_v14 = vadd.f32 %v3102_v24, %v1229_v32  ;;  %v1370_v42 = vsel %vm1334_vm6, %v3148_v61, -inf  ;;  %v1893_v30 = vsel %vm1307_vm10, 0.0, %v1275_v11 }
 0x3cf   :  { %2431 = vpow2.f32 %v1463_v33  ;;  %v1921_v40 = vrot.slane %v1920_v29, 2  ;;  %v1361_v38 = vrot.slane %v1360_v17, 1  ;;  %v1371_v3 = vrot.slane %v1370_v42, 4 }
 0x3d0   :  { %v1353_v44 = vmax.f32 %v1351_v62, %v1352_v36  ;;  %v1929_v46 = vadd.f32 %v1928_v34, %v1927_v21  ;;  %v1939_v35 = vsel %vm1334_vm6, %v1893_v30, 0.0  ;;  %v1279_v47 = vadd.f32 %v3102_v24, %v1244_v37  ;;  %v1292_v62 = vld [vmem:[%s3589_s2 + $0x30] sm:$0xff] }
 0x3d1   :  { %v1922_v43 = vadd.f32 %v1921_v40, %v1920_v29  ;;  %v1362_v48 = vmax.f32 %v1360_v17, %v1361_v38  ;;  %v1372_v39 = vmax.f32 %v1370_v42, %v1371_v3  ;;  %v3158_v51 = vsel %vm1306_vm12, -1e+09, %v1274_v14  ;;  %v1241_v29 = vpop.xlane.xlu0 %1240  ;;  %v1235_v3 = vpop.xlane.xlu1 %1234 }
 0x3d2   :  { %v1354_v10 = vrot.slane %v1353_v44, 1  ;;  %v1940_v52 = vrot.slane %v1939_v35, 4  ;;  %v3162_v5 = vsel %vm1311_vm11, -1e+09, %v1279_v47  ;;  %v1897_v53 = vsel %vm1311_vm11, 0.0, %v1279_v47 }
 0x3d3   :  { %v1923_v50 = vrot.slane %v1922_v43, 1  ;;  %v1450_v54 = vsub.f32 %v3123_v55, %v1362_v48  ;;  %v1373_v45 = vrot.slane %v1372_v39, 2  ;;  %v1398_v59 = vsel %vm1334_vm6, %v3162_v5, -inf }
 0x3d4   :  { %v1355_v57 = vmax.f32 %v1353_v44, %v1354_v10  ;;  %v1930_v12 = vrot.slane %v1929_v46, 1  ;;  %v1941_v60 = vadd.f32 %v1940_v52, %v1939_v35  ;;  %v1399_v63 = vrot.slane %v1398_v59, 4 }
 0x3d5   :  { %v1967_v0 = vsel %vm1334_vm6, %v1897_v53, 0.0  ;;  %v1469_v2 = vmul.f32 1.442695, %v1450_v54  ;;  %v1374_v16 = vmax.f32 %v1372_v39, %v1373_v45  ;;  %v1924_v18 = vadd.f32 %v1923_v50, %v1922_v43 }
 0x3d6   :  { %v1449_v4 = vsub.f32 %v3139_v41, %v1355_v57  ;;  %v1968_v8 = vrot.slane %v1967_v0, 4  ;;  %v1942_v6 = vrot.slane %v1941_v60, 2  ;;  %v1400_v9 = vmax.f32 %v1398_v59, %v1399_v63 }
 0x3d7   :  { %v1363_v55 = vsel %vm1334_vm6, %v3158_v51, -inf  ;;  %2433 = vpow2.f32 %v1469_v2  ;;  %v1375_v15 = vrot.slane %v1374_v16, 1  ;;  %v2032_v58 = vsel %vm1863_vm13, %v1917_v56, %v1910_v22  ;;  %v1250_v2 = vpop.xlane.xlu0 %1249 }
 0x3d8   :  { %v1467_v13 = vmul.f32 1.442695, %v1449_v4  ;;  %v1969_v19 = vadd.f32 %v1968_v8, %v1967_v0  ;;  %v1931_v20 = vadd.f32 %v1930_v12, %v1929_v46  ;;  %v1401_v49 = vrot.slane %v1400_v9, 2 }
 0x3d9   :  { %v1364_v21 = vrot.slane %v1363_v55, 4  ;;  %v1376_v41 = vmax.f32 %v1374_v16, %v1375_v15  ;;  %v1892_v7 = vsel %vm1306_vm12, 0.0, %v1274_v14  ;;  %v2033_v56 = vsel %vm1865_vm14, %v1924_v18, %v2032_v58  ;;  %v3196_v14 = vld [vmem:[%s3589_s2 + $0x58] sm:$0xff] }
 0x3da   :  { %v3174_v23 = vpop.eup %2429  ;;  %2435 = vpow2.f32 %v1467_v13  ;;  %v1970_v25 = vrot.slane %v1969_v19, 2  ;;  %v1402_v28 = vmax.f32 %v1400_v9, %v1401_v49  ;;  %v1943_v33 = vadd.f32 %v1942_v6, %v1941_v60 }
 0x3db   :  { %v1502_v27 = vsel %vm1334_vm6, %v3174_v23, 0.0  ;;  %v1365_v31 = vmax.f32 %v1363_v55, %v1364_v21  ;;  %v1452_v1 = vsub.f32 %v3148_v61, %v1376_v41  ;;  %v1932_v34 = vsel %vm1334_vm6, %v1892_v7, 0.0 }
 0x3dc   :  { %v3187_v11 = vpop.eup %2431  ;;  %v1503_v32 = vrot.slane %v1502_v27, 4  ;;  %v1403_v36 = vrot.slane %v1402_v28, 1  ;;  %vm1310_vm1 = vcmp.eq.f32.partialorder %v1294_v26, 0.0  ;;  %v1971_v42 = vadd.f32 %v1970_v25, %v1969_v19 }
 0x3dd   :  { %v1495_v17 = vsel %vm1334_vm6, %v3187_v11, 0.0  ;;  %v1366_v37 = vrot.slane %v1365_v31, 2  ;;  %v1473_v40 = vmul.f32 1.442695, %v1452_v1  ;;  %v3199_v30 = vsel %vm1867_vm15, %v1931_v20, %v2033_v56 }
 0x3de   :  { %vm1308_vm3 = vcmp.eq.f32.partialorder %v1292_v62, 0.0  ;;  %v1404_v61 = vmax.f32 %v1402_v28, %v1403_v36  ;;  %v1933_v38 = vrot.slane %v1932_v34, 4  ;;  %v1278_v44 = vadd.f32 %v3102_v24, %v1241_v29  ;;  %v3245_v36 = vpop.xlane.xlu0 %1246 }
 0x3df   :  { %v1367_v22 = vmax.f32 %v1365_v31, %v1366_v37  ;;  %v3202_v46 = vadd.f32 %v1503_v32, %v1502_v27  ;;  %v1496_v43 = vrot.slane %v1495_v17, 4  ;;  %2437 = vpow2.f32 %v1473_v40 }
 0x3e0   :  { %v1944_v35 = vrot.slane %v1943_v33, 1  ;;  %vm1313_vm0 = vcmp.eq.f32.partialorder %v3196_v14, 0.0  ;;  %v1456_v47 = vsub.f32 %v3162_v5, %v1404_v61  ;;  %v1934_v10 = vadd.f32 %v1933_v38, %v1932_v34 }
 0x3e1   :  { %v1368_v48 = vrot.slane %v1367_v22, 1  ;;  %v3207_v39 = vsel %vm1310_vm1, -1e+09, %v1278_v44  ;;  %v1972_v50 = vrot.slane %v1971_v42, 1  ;;  %v1896_v53 = vsel %vm1310_vm1, 0.0, %v1278_v44 }
 0x3e2   :  { %v1391_v52 = vsel %vm1334_vm6, %v3207_v39, -inf  ;;  %v1276_v54 = vadd.f32 %v3102_v24, %v1235_v3  ;;  %v1481_v57 = vmul.f32 1.442695, %v1456_v47  ;;  %v1935_v59 = vrot.slane %v1934_v10, 2 }
 0x3e3   :  { %v1369_v45 = vmax.f32 %v1367_v22, %v1368_v48  ;;  %v1392_v12 = vrot.slane %v1391_v52, 4  ;;  %v3213_v60 = vadd.f32 %v1496_v43, %v1495_v17  ;;  %v1960_v5 = vsel %vm1334_vm6, %v1896_v53, 0.0  ;;  %v3258_v43 = vld [vmem:[%s3589_s2 + $0x50] sm:$0xff] }
 0x3e4   :  { %v3217_v63 = vsel %vm1308_vm3, -1e+09, %v1276_v54  ;;  %v1894_v0 = vsel %vm1308_vm3, 0.0, %v1276_v54  ;;  %v3220_v4 = vpop.eup %2433  ;;  %2439 = vpow2.f32 %v1481_v57  ;;  %v1936_v8 = vadd.f32 %v1935_v59, %v1934_v10 }
 0x3e5   :  { %v1451_v16 = vsub.f32 %v3158_v51, %v1369_v45  ;;  %v1393_v18 = vmax.f32 %v1391_v52, %v1392_v12  ;;  %v1516_v6 = vsel %vm1334_vm6, %v3220_v4, 0.0  ;;  %v1961_v9 = vrot.slane %v1960_v5, 4  ;;  %v3234_v51 = vld [vmem:[%s3589_s2 + $0x38] sm:$0xff]  ;;  %v3267_v52 = vld [vmem:[%s3589_s2 + $0x68] sm:$0xff] }
 0x3e6   :  { %v1377_v55 = vsel %vm1334_vm6, %v3217_v63, -inf  ;;  %v1946_v13 = vsel %vm1334_vm6, %v1894_v0, 0.0  ;;  %v1937_v58 = vrot.slane %v1936_v8, 1  ;;  %v1281_v49 = vadd.f32 %v3102_v24, %v1250_v2 }
 0x3e7   :  { %v3228_v15 = vpop.eup %2435  ;;  %v1471_v19 = vmul.f32 1.442695, %v1451_v16  ;;  %v1394_v20 = vrot.slane %v1393_v18, 2  ;;  %v1517_v21 = vrot.slane %v1516_v6, 4  ;;  %v1962_v41 = vadd.f32 %v1961_v9, %v1960_v5 }
 0x3e8   :  { %v1378_v25 = vrot.slane %v1377_v55, 4  ;;  %v1947_v7 = vrot.slane %v1946_v13, 4  ;;  %v1509_v26 = vsel %vm1334_vm6, %v3228_v15, 0.0  ;;  %v1945_v27 = vadd.f32 %v1944_v35, %v1943_v33 }
 0x3e9   :  { %2441 = vpow2.f32 %v1471_v19  ;;  %v1938_v56 = vadd.f32 %v1937_v58, %v1936_v8  ;;  %v1395_v28 = vmax.f32 %v1393_v18, %v1394_v20  ;;  %v1963_v31 = vrot.slane %v1962_v41, 2  ;;  %v1256_v18 = vpop.xlane.xlu0 %1255 }
 0x3ea   :  { %v1379_v62 = vmax.f32 %v1377_v55, %v1378_v25  ;;  %v1948_v32 = vadd.f32 %v1947_v7, %v1946_v13  ;;  %vm1309_vm7 = vcmp.eq.f32.partialorder %v3234_v51, 0.0  ;;  %v1505_v1 = vrot.slane %v3202_v46, 2 }
 0x3eb   :  { %v1498_v34 = vrot.slane %v3213_v60, 2  ;;  %v1973_v29 = vadd.f32 %v1972_v50, %v1971_v42  ;;  %v3243_v17 = vsel %vm1313_vm0, -1e+09, %v1281_v49  ;;  %v3247_v33 = vadd.f32 %v1517_v21, %v1516_v6  ;;  %v1238_v50 = vpop.xlane.xlu1 %1237 }
 0x3ec   :  { %v1396_v37 = vrot.slane %v1395_v28, 1  ;;  %v1964_v40 = vadd.f32 %v1963_v31, %v1962_v41  ;;  %v1380_v61 = vrot.slane %v1379_v62, 2  ;;  %v3249_v22 = vpop.eup %2437  ;;  %v1510_v38 = vrot.slane %v1509_v26, 4 }
 0x3ed   :  { %v1949_v44 = vrot.slane %v1948_v32, 2  ;;  %v1412_v3 = vsel %vm1334_vm6, %v3243_v17, -inf  ;;  %v1899_v42 = vsel %vm1313_vm0, 0.0, %v1281_v49  ;;  %v1530_v35 = vsel %vm1334_vm6, %v3249_v22, 0.0 }
 0x3ee   :  { %v2035_v47 = vsel %vm1869_vm4, %v1938_v56, %v3199_v30  ;;  %v1397_v48 = vmax.f32 %v1395_v28, %v1396_v37  ;;  %v1381_v10 = vmax.f32 %v1379_v62, %v1380_v61  ;;  %v1965_v14 = vrot.slane %v1964_v40, 1  ;;  %v3275_v30 = vld [vmem:[%s3589_s2 + $0x60] sm:$0xff] }
 0x3ef   :  { %v1950_v53 = vadd.f32 %v1949_v44, %v1948_v32  ;;  %v1413_v54 = vrot.slane %v1412_v3, 4  ;;  %v1981_v57 = vsel %vm1334_vm6, %v1899_v42, 0.0  ;;  %v1531_v45 = vrot.slane %v1530_v35, 4  ;;  %v1253_v44 = vpop.xlane.xlu0 %1252 }
 0x3f0   :  { %v1455_v59 = vsub.f32 %v3207_v39, %v1397_v48  ;;  %v1382_v12 = vrot.slane %v1381_v10, 1  ;;  %v1982_v5 = vrot.slane %v1981_v57, 4  ;;  %vm1312_vm9 = vcmp.eq.f32.partialorder %v3258_v43, 0.0 }
 0x3f1   :  { %v3277_v0 = vadd.f32 %v1510_v38, %v1509_v26  ;;  %v1951_v2 = vrot.slane %v1950_v53, 1  ;;  %v1414_v16 = vmax.f32 %v1412_v3, %v1413_v54  ;;  %v1277_v8 = vadd.f32 %v3102_v24, %v1238_v50  ;;  %v3281_v6 = vpop.eup %2439 }
 0x3f2   :  { %vm1315_vm10 = vcmp.eq.f32.partialorder %v3267_v52, 0.0  ;;  %v1519_v39 = vrot.slane %v3247_v33, 2  ;;  %v1479_v9 = vmul.f32 1.442695, %v1455_v59  ;;  %v1383_v55 = vmax.f32 %v1381_v10, %v1382_v12 }
 0x3f3   :  { %v1983_v13 = vadd.f32 %v1982_v5, %v1981_v57  ;;  %v1558_v19 = vsel %vm1334_vm6, %v3281_v6, 0.0  ;;  %v1966_v58 = vadd.f32 %v1965_v14, %v1964_v40  ;;  %v2036_v20 = vsel %vm1871_vm5, %v1945_v27, %v2035_v47 }
 0x3f4   :  { %v1415_v49 = vrot.slane %v1414_v16, 2  ;;  %vm1314_vm11 = vcmp.eq.f32.partialorder %v3275_v30, 0.0  ;;  %v3288_v21 = vadd.f32 %v1531_v45, %v1530_v35  ;;  %2443 = vpow2.f32 %v1479_v9  ;;  %v3339_v9 = vld [vmem:[%s3589_s2 + $0x70] sm:$0xff] }
 0x3f5   :  { %v1453_v41 = vsub.f32 %v3217_v63, %v1383_v55  ;;  %v1952_v25 = vadd.f32 %v1951_v2, %v1950_v53  ;;  %v1512_v7 = vrot.slane %v3277_v0, 2  ;;  %v3294_v56 = vsel %vm1309_vm7, -1e+09, %v1277_v8 }
 0x3f6   :  { %v1416_v26 = vmax.f32 %v1414_v16, %v1415_v49  ;;  %v1895_v28 = vsel %vm1309_vm7, 0.0, %v1277_v8  ;;  %v3298_v27 = vpop.eup %2441  ;;  %v1559_v31 = vrot.slane %v1558_v19, 4  ;;  %v1984_v32 = vrot.slane %v1983_v13, 2 }
 0x3f7   :  { %v1475_v62 = vmul.f32 1.442695, %v1453_v41  ;;  %v1384_v37 = vsel %vm1334_vm6, %v3294_v56, -inf  ;;  %v3303_v63 = vsel %vm1863_vm13, %v1973_v29, %v1966_v58  ;;  %v1953_v38 = vsel %vm1334_vm6, %v1895_v28, 0.0 }
 0x3f8   :  { %v1417_v40 = vrot.slane %v1416_v26, 1  ;;  %v1385_v61 = vrot.slane %v1384_v37, 4  ;;  %v1533_v3 = vrot.slane %v3288_v21, 2  ;;  %v3309_v51 = vsel %vm1334_vm6, %v3298_v27, 0.0 }
 0x3f9   :  { %2445 = vpow2.f32 %v1475_v62  ;;  %v2037_v42 = vsel %vm1873_vm8, %v1952_v25, %v2036_v20  ;;  %v1954_v48 = vrot.slane %v1953_v38, 4  ;;  %v1280_v29 = vadd.f32 %v3102_v24, %v3245_v36 }
 0x3fa   :  { %v1418_v35 = vmax.f32 %v1416_v26, %v1417_v40  ;;  %v1386_v47 = vmax.f32 %v1384_v37, %v1385_v61  ;;  %v3314_v10 = vadd.f32 %v1559_v31, %v1558_v19  ;;  %v3316_v50 = vadd.f32 %v1984_v32, %v1983_v13 }
 0x3fb   :  { %vm1875_vm12 = vcmask 1047559   ;;  %v1283_v14 = vadd.f32 %v3102_v24, %v1256_v18  ;;  %v3320_v53 = vadd.f32 %v3102_v24, %v1253_v44  ;;  %v1955_v45 = vadd.f32 %v1954_v48, %v1953_v38 }
 0x3fc   :  { %v1458_v54 = vsub.f32 %v3243_v17, %v1418_v35  ;;  %v1387_v57 = vrot.slane %v1386_v47, 2  ;;  %v3325_v59 = vsel %vm1312_vm9, -1e+09, %v1280_v29  ;;  %v1524_v36 = vrot.slane %v3309_v51, 4 }
 0x3fd   :  { %v1405_v12 = vsel %vm1334_vm6, %v3325_v59, -inf  ;;  %v1898_v5 = vsel %vm1312_vm9, 0.0, %v1280_v29  ;;  %v3334_v2 = vsel %vm1315_vm10, -1e+09, %v1283_v14  ;;  %v1956_v8 = vrot.slane %v1955_v45, 2 }
 0x3fe   :  { %v1485_v16 = vmul.f32 1.442695, %v1458_v54  ;;  %v1388_v17 = vmax.f32 %v1386_v47, %v1387_v57  ;;  %v1406_v18 = vrot.slane %v1405_v12, 4  ;;  %v1974_v55 = vsel %vm1334_vm6, %v1898_v5, 0.0 }
 0x3ff   :  { %v1426_v13 = vsel %vm1334_vm6, %v3334_v2, -inf  ;;  %v1901_v43 = vsel %vm1315_vm10, 0.0, %v1283_v14  ;;  %v3349_v19 = vsel %vm1314_vm11, -1e+09, %v3320_v53  ;;  %v1957_v20 = vadd.f32 %v1956_v8, %v1955_v45  ;;  %v3363_v14 = vld [vmem:[%s3589_s2 + $0x78] sm:$0xff] }
 0x400   :  { %2447 = vpow2.f32 %v1485_v16  ;;  %v1389_v58 = vrot.slane %v1388_v17, 1  ;;  %v1407_v49 = vmax.f32 %v1405_v12, %v1406_v18  ;;  %v1975_v41 = vrot.slane %v1974_v55, 4 }
 0x401   :  { %v1427_v25 = vrot.slane %v1426_v13, 4  ;;  %v1995_v26 = vsel %vm1334_vm6, %v1901_v43, 0.0  ;;  %v1419_v28 = vsel %vm1334_vm6, %v3349_v19, -inf  ;;  %vm1316_vm1 = vcmp.eq.f32.partialorder %v3339_v9, 0.0  ;;  %v3355_v52 = vpop.eup %2443 }
 0x402   :  { %v1390_v31 = vmax.f32 %v1388_v17, %v1389_v58  ;;  %v1958_v62 = vrot.slane %v1957_v20, 1  ;;  %v1408_v32 = vrot.slane %v1407_v49, 2  ;;  %v1996_v37 = vrot.slane %v1995_v26, 4  ;;  %v1259_v58 = vpop.xlane.xlu0 %1258 }
 0x403   :  { %v1551_v40 = vsel %vm1334_vm6, %v3355_v52, 0.0  ;;  %v1976_v61 = vadd.f32 %v1975_v41, %v1974_v55  ;;  %v1428_v38 = vmax.f32 %v1426_v13, %v1427_v25  ;;  %v1420_v44 = vrot.slane %v1419_v28, 4 }
 0x404   :  { %v1552_v35 = vrot.slane %v1551_v40, 4  ;;  %v1454_v47 = vsub.f32 %v3294_v56, %v1390_v31  ;;  %v1959_v48 = vadd.f32 %v1958_v62, %v1957_v20  ;;  %v1409_v29 = vmax.f32 %v1407_v49, %v1408_v32 }
 0x405   :  { %v1977_v54 = vrot.slane %v1976_v61, 2  ;;  %v1429_v57 = vrot.slane %v1428_v38, 2  ;;  %v1997_v45 = vadd.f32 %v1996_v37, %v1995_v26  ;;  %v1421_v12 = vmax.f32 %v1419_v28, %v1420_v44 }
 0x406   :  { %v3365_v5 = vpop.eup %2445  ;;  %v1986_v16 = vrot.slane %v3316_v50, 1  ;;  %v1477_v17 = vmul.f32 1.442695, %v1454_v47  ;;  %v2038_v8 = vsel %vm1875_vm12, %v1959_v48, %v2037_v42  ;;  %v1410_v18 = vrot.slane %v1409_v29, 1 }
 0x407   :  { %v1537_v56 = vsel %vm1334_vm6, %v3365_v5, 0.0  ;;  %2048 = vst.msk [vmem:[%s3600_s13] sm:$0xff] %vm1334_vm6, %v2038_v8  ;;  %v1978_v55 = vadd.f32 %v1977_v54, %v1976_v61  ;;  %v1430_v13 = vmax.f32 %v1428_v38, %v1429_v57  ;;  %v1998_v43 = vrot.slane %v1997_v45, 2 }
 0x408   :  { %vm1317_vm3 = vcmp.eq.f32.partialorder %v3363_v14, 0.0  ;;  %v1561_v20 = vrot.slane %v3314_v10, 2  ;;  %v3378_v49 = vadd.f32 %v1524_v36, %v3309_v51  ;;  %2449 = vpow2.f32 %v1477_v17 }
 0x409   :  { %v1411_v42 = vmax.f32 %v1409_v29, %v1410_v18  ;;  %v3380_v41 = vadd.f32 %v1552_v35, %v1551_v40  ;;  %v1538_v25 = vrot.slane %v1537_v56, 4  ;;  %v1431_v26 = vrot.slane %v1430_v13, 1  ;;  %v1262_v29 = vpop.xlane.xlu0 %1261 }
 0x40a   :  { %v1422_v28 = vrot.slane %v1421_v12, 2  ;;  %v1979_v62 = vrot.slane %v1978_v55, 1  ;;  %v1900_v32 = vsel %vm1314_vm11, 0.0, %v3320_v53  ;;  %v1284_v37 = vadd.f32 %v3102_v24, %v1259_v58 }
 0x40b   :  { %v1457_v31 = vsub.f32 %v3325_v59, %v1411_v42  ;;  %v3388_v61 = vadd.f32 %v1986_v16, %v3316_v50  ;;  %v1432_v51 = vmax.f32 %v1430_v13, %v1431_v26  ;;  %v1999_v36 = vadd.f32 %v1998_v43, %v1997_v45 }
 0x40c   :  { %v1423_v38 = vmax.f32 %v1421_v12, %v1422_v28  ;;  %v1526_v40 = vrot.slane %v3378_v49, 2  ;;  %v1988_v35 = vsel %vm1334_vm6, %v1900_v32, 0.0  ;;  %v3394_v59 = vsel %vm1316_vm1, -1e+09, %v1284_v37 }
 0x40d   :  { %v1483_v44 = vmul.f32 1.442695, %v1457_v31  ;;  %v3396_v47 = vpop.eup %2447  ;;  %v1554_v30 = vrot.slane %v3380_v41, 2  ;;  %v3399_v53 = vadd.f32 %v1538_v25, %v1537_v56  ;;  %v1460_v50 = vsub.f32 %v3334_v2, %v1432_v51 }
 0x40e   :  { %v1424_v48 = vrot.slane %v1423_v38, 1  ;;  %v1572_v54 = vsel %vm1334_vm6, %v3396_v47, 0.0  ;;  %v1980_v57 = vadd.f32 %v1979_v62, %v1978_v55  ;;  %v1989_v45 = vrot.slane %v1988_v35, 4 }
 0x40f   :  { %2451 = vpow2.f32 %v1483_v44  ;;  %v1489_v12 = vmul.f32 1.442695, %v1460_v50  ;;  %v2000_v16 = vrot.slane %v1999_v36, 1  ;;  %v1433_v8 = vsel %vm1334_vm6, %v3394_v59, -inf }
 0x410   :  { %v1425_v17 = vmax.f32 %v1423_v38, %v1424_v48  ;;  %v1990_v18 = vadd.f32 %v1989_v45, %v1988_v35  ;;  %v1434_v13 = vrot.slane %v1433_v8, 4  ;;  %v1902_v56 = vsel %vm1316_vm1, 0.0, %v1284_v37 }
 0x411   :  { %v1285_v2 = vadd.f32 %v3102_v24, %v1262_v29  ;;  %v1573_v43 = vrot.slane %v1572_v54, 4  ;;  %2453 = vpow2.f32 %v1489_v12  ;;  %v2002_v55 = vsel %vm1334_vm6, %v1902_v56, 0.0 }
 0x412   :  { %v1459_v58 = vsub.f32 %v3349_v19, %v1425_v17  ;;  %v1991_v42 = vrot.slane %v1990_v18, 2  ;;  %v1435_v25 = vmax.f32 %v1433_v8, %v1434_v13  ;;  %v2003_v26 = vrot.slane %v2002_v55, 4 }
 0x413   :  { %v3413_v28 = vsel %vm1317_vm3, -1e+09, %v1285_v2  ;;  %v2040_v31 = vsel %vm1865_vm14, %v1980_v57, %v3303_v63  ;;  %v1903_v62 = vsel %vm1317_vm3, 0.0, %v1285_v2  ;;  %v3423_v44 = vadd.f32 %v1573_v43, %v1572_v54 }
 0x414   :  { %v1487_v9 = vmul.f32 1.442695, %v1459_v58  ;;  %v1440_v24 = vsel %vm1334_vm6, %v3413_v28, -inf  ;;  %v1992_v19 = vadd.f32 %v1991_v42, %v1990_v18  ;;  %v1436_v32 = vrot.slane %v1435_v25, 2 }
 0x415   :  { %v2004_v37 = vadd.f32 %v2003_v26, %v2002_v55  ;;  %v1441_v51 = vrot.slane %v1440_v24, 4  ;;  %v3421_v38 = vpop.eup %2449  ;;  %v2009_v35 = vsel %vm1334_vm6, %v1903_v62, 0.0  ;;  %v1506_v63 = vadd.f32 %v1505_v1, %v3202_v46 }
 0x416   :  { %v1499_v50 = vadd.f32 %v1498_v34, %v3213_v60  ;;  %2455 = vpow2.f32 %v1487_v9  ;;  %v1993_v14 = vrot.slane %v1992_v19, 1  ;;  %v1437_v48 = vmax.f32 %v1435_v25, %v1436_v32 }
 0x417   :  { %v2005_v29 = vrot.slane %v2004_v37, 2  ;;  %v1544_v57 = vsel %vm1334_vm6, %v3421_v38, 0.0  ;;  %v1442_v45 = vmax.f32 %v1440_v24, %v1441_v51  ;;  %v2010_v54 = vrot.slane %v2009_v35, 4 }
 0x418   :  { %v1507_v12 = vrot.slane %v1506_v63, 1  ;;  %v1994_v17 = vadd.f32 %v1993_v14, %v1992_v19  ;;  %v1438_v8 = vrot.slane %v1437_v48, 1  ;;  %v1500_v13 = vrot.slane %v1499_v50, 1 }
 0x419   :  { %v2006_v18 = vadd.f32 %v2005_v29, %v2004_v37  ;;  %v1540_v46 = vrot.slane %v3399_v53, 2  ;;  %v1443_v1 = vrot.slane %v1442_v45, 2  ;;  %v2011_v56 = vadd.f32 %v2010_v54, %v2009_v35 }
 0x41a   :  { %v1508_v2 = vadd.f32 %v1507_v12, %v1506_v63  ;;  %v2001_v60 = vadd.f32 %v2000_v16, %v1999_v36  ;;  %v1439_v34 = vmax.f32 %v1437_v48, %v1438_v8  ;;  %v1501_v58 = vadd.f32 %v1500_v13, %v1499_v50 }
 0x41b   :  { %v2007_v43 = vrot.slane %v2006_v18, 1  ;;  %v1545_v42 = vrot.slane %v1544_v57, 4  ;;  %v2041_v25 = vsel %vm1867_vm15, %v3388_v61, %v2040_v31  ;;  %v1444_v26 = vmax.f32 %v1442_v45, %v1443_v1 }
 0x41c   :  { %v3435_v55 = vpop.eup %2451  ;;  %v2012_v9 = vrot.slane %v2011_v56, 2  ;;  %v1575_v24 = vrot.slane %v3423_v44, 2  ;;  %v2042_v62 = vsel %vm1869_vm4, %v1994_v17, %v2041_v25  ;;  %v1461_v19 = vsub.f32 %v3394_v59, %v1439_v34 }
 0x41d   :  { %2457 = vrcp.f32 %v1508_v2  ;;  %v1565_v36 = vsel %vm1334_vm6, %v3435_v55, 0.0  ;;  %v1445_v16 = vrot.slane %v1444_v26, 1  ;;  %v2008_v35 = vadd.f32 %v2007_v43, %v2006_v18 }
 0x41e   :  { %v2013_v32 = vadd.f32 %v2012_v9, %v2011_v56  ;;  %2459 = vrcp.f32 %v1501_v58  ;;  %v3444_v37 = vpop.eup %2453  ;;  %v1491_v51 = vmul.f32 1.442695, %v1461_v19  ;;  %v1520_v61 = vadd.f32 %v1519_v39, %v3247_v33 }
 0x41f   :  { %v1513_v31 = vadd.f32 %v1512_v7, %v3277_v0  ;;  %v1546_v59 = vadd.f32 %v1545_v42, %v1544_v57  ;;  %v2043_v63 = vsel %vm1871_vm5, %v2001_v60, %v2042_v62  ;;  %v1446_v50 = vmax.f32 %v1444_v26, %v1445_v16 }
 0x420   :  { %v2014_v14 = vrot.slane %v2013_v32, 1  ;;  %v1566_v48 = vrot.slane %v1565_v36, 4  ;;  %2461 = vpow2.f32 %v1491_v51  ;;  %v1521_v29 = vrot.slane %v1520_v61, 1 }
 0x421   :  { %v1514_v45 = vrot.slane %v1513_v31, 1  ;;  %v1586_v54 = vsel %vm1334_vm6, %v3444_v37, 0.0  ;;  %v1462_v12 = vsub.f32 %v3413_v28, %v1446_v50  ;;  %v1534_v33 = vadd.f32 %v1533_v3, %v3288_v21 }
 0x422   :  { %v2015_v17 = vadd.f32 %v2014_v14, %v2013_v32  ;;  %v2044_v0 = vsel %vm1873_vm8, %v2008_v35, %v2043_v63  ;;  %v1522_v39 = vadd.f32 %v1521_v29, %v1520_v61  ;;  %v1527_v57 = vadd.f32 %v1526_v40, %v3378_v49 }
 0x423   :  { %v1515_v7 = vadd.f32 %v1514_v45, %v1513_v31  ;;  %v3463_v8 = vpop.eup %2455  ;;  %v1547_v18 = vrot.slane %v1546_v59, 2  ;;  %v1493_v13 = vmul.f32 1.442695, %v1462_v12  ;;  %v1535_v28 = vrot.slane %v1534_v33, 1 }
 0x424   :  { %v2045_v1 = vsel %vm1875_vm12, %v2015_v17, %v2044_v0  ;;  %v1567_v56 = vadd.f32 %v1566_v48, %v1565_v36  ;;  %v1587_v2 = vrot.slane %v1586_v54, 4  ;;  %2463 = vrcp.f32 %v1522_v39 }
 0x425   :  { %2049 = vst.msk [vmem:[%s3600_s13 + $0x8] sm:$0xff] %vm1334_vm6, %v2045_v1  ;;  %v1528_v21 = vrot.slane %v1527_v57, 1  ;;  %2465 = vpow2.f32 %v1493_v13  ;;  %v1536_v3 = vadd.f32 %v1535_v28, %v1534_v33  ;;  %v1562_v49 = vadd.f32 %v1561_v20, %v3314_v10 }
 0x426   :  { %v1541_v40 = vadd.f32 %v1540_v46, %v3399_v53  ;;  %v1579_v60 = vsel %vm1334_vm6, %v3463_v8, 0.0  ;;  %2467 = vrcp.f32 %v1515_v7  ;;  %v1555_v43 = vadd.f32 %v1554_v30, %v3380_v41 }
 0x427   :  { %v1529_v34 = vadd.f32 %v1528_v21, %v1527_v57  ;;  %2469 = vrcp.f32 %v1536_v3  ;;  %v1563_v58 = vrot.slane %v1562_v49, 1  ;;  %v1548_v25 = vadd.f32 %v1547_v18, %v1546_v59 }
 0x428   :  { %v1542_v42 = vrot.slane %v1541_v40, 1  ;;  %v1568_v26 = vrot.slane %v1567_v56, 2  ;;  %v1588_v9 = vadd.f32 %v1587_v2, %v1586_v54  ;;  %v1580_v10 = vrot.slane %v1579_v60, 4 }
 0x429   :  { %2471 = vrcp.f32 %v1529_v34  ;;  %v1564_v20 = vadd.f32 %v1563_v58, %v1562_v49  ;;  %v1549_v46 = vrot.slane %v1548_v25, 1  ;;  %v1556_v16 = vrot.slane %v1555_v43, 1 }
 0x42a   :  { %v2458_v62 = vpop.eup %2457  ;;  %v1543_v53 = vadd.f32 %v1542_v42, %v1541_v40  ;;  %v1576_v32 = vadd.f32 %v1575_v24, %v3423_v44  ;;  %v1589_v35 = vrot.slane %v1588_v9, 2  ;;  %v1581_v61 = vadd.f32 %v1580_v10, %v1579_v60 }
 0x42b   :  { %v2460_v19 = vpop.eup %2459  ;;  %v1624_v36 = vmul.f32 %v2458_v62, %v3174_v23  ;;  %v1550_v30 = vadd.f32 %v1549_v46, %v1548_v25  ;;  %v1569_v31 = vadd.f32 %v1568_v26, %v1567_v56  ;;  %v1557_v63 = vadd.f32 %v1556_v16, %v1555_v43 }
 0x42c   :  { %v1623_v41 = vmul.f32 %v2460_v19, %v3187_v11  ;;  %2473 = vrcp.f32 %v1543_v53  ;;  %v1577_v23 = vrot.slane %v1576_v32, 1  ;;  %v1582_v24 = vrot.slane %v1581_v61, 2 }
 0x42d   :  { %1646 = vperm.xlu0 %2299, %v1624_v36   ;;  %v3482_v51 = vpop.eup %2461  ;;  %2475 = vrcp.f32 %v1564_v20  ;;  %v1570_v11 = vrot.slane %v1569_v31, 1  ;;  %v1590_v14 = vadd.f32 %v1589_v35, %v1588_v9 }
 0x42e   :  { %1641 = vperm.xlu1 %2300, %v1623_v41   ;;  %v1593_v59 = vsel %vm1334_vm6, %v3482_v51, 0.0  ;;  %2477 = vrcp.f32 %v1550_v30  ;;  %v1578_v54 = vadd.f32 %v1577_v23, %v1576_v32  ;;  %v1583_v13 = vadd.f32 %v1582_v24, %v1581_v61 }
 0x42f   :  { %v1594_v50 = vrot.slane %v1593_v59, 4  ;;  %2479 = vrcp.f32 %v1557_v63  ;;  %v1591_v18 = vrot.slane %v1590_v14, 1 }
 0x430   :  { %2481 = vrcp.f32 %v1578_v54  ;;  %v1584_v3 = vrot.slane %v1583_v13, 1 }
 0x431   :  { %v2464_v44 = vpop.eup %2463  ;;  %v1595_v29 = vadd.f32 %v1594_v50, %v1593_v59  ;;  %v1592_v21 = vadd.f32 %v1591_v18, %v1590_v14 }
 0x432   :  { %v3486_v48 = vpop.eup %2465  ;;  %v1626_v45 = vmul.f32 %v2464_v44, %v3220_v4  ;;  %v1571_v4 = vadd.f32 %v1570_v11, %v1569_v31  ;;  %v1585_v43 = vadd.f32 %v1584_v3, %v1583_v13  ;;  %v2495_v44 = vld [vmem:[%s3588_s1 + $0x18] sm:$0xff]  ;;  %v2498_v3 = vld [vmem:[%s3588_s1 + $0x20] sm:$0xff] }
 0x433   :  { %v2468_v12 = vpop.eup %2467  ;;  %v1600_v17 = vsel %vm1334_vm6, %v3486_v48, 0.0  ;;  %v1596_v1 = vrot.slane %v1595_v29, 2 }
 0x434   :  { %v2470_v33 = vpop.eup %2469  ;;  %v1601_v0 = vrot.slane %v1600_v17, 4  ;;  %1656 = vperm.xlu1 %2300, %v1626_v45   ;;  %v1625_v39 = vmul.f32 %v2468_v12, %v3228_v15  ;;  %2483 = vrcp.f32 %v1571_v4  ;;  %v2496_v12 = vld [vmem:[%s3588_s1 + $0x28] sm:$0xff] }
 0x435   :  { %v1628_v57 = vmul.f32 %v2470_v33, %v3249_v22  ;;  %v1597_v60 = vadd.f32 %v1596_v1, %v1595_v29  ;;  %2485 = vrcp.f32 %v1592_v21  ;;  %v2497_v33 = vld [vmem:[%s3588_s1 + $0x10] sm:$0xff] }
 0x436   :  { %v2472_v7 = vpop.eup %2471  ;;  %v1602_v28 = vadd.f32 %v1601_v0, %v1600_v17  ;;  %2487 = vrcp.f32 %v1585_v43 }
 0x437   :  { %1666 = vperm.xlu0 %2299, %v1628_v57   ;;  %v1627_v56 = vmul.f32 %v2472_v7, %v3298_v27  ;;  %v1598_v42 = vrot.slane %v1597_v60, 1 }
 0x438   :  { %1651 = vperm.xlu1 %2300, %v1625_v39   ;;  %v1603_v40 = vrot.slane %v1602_v28, 2 }
 0x439   :  { %v2474_v2 = vpop.eup %2473 }
 0x43a   :  { %v2476_v49 = vpop.eup %2475  ;;  %v1629_v15 = vmul.f32 %v2474_v2, %v3365_v5  ;;  %v1604_v27 = vadd.f32 %v1603_v40, %v1602_v28  ;;  %v1599_v5 = vadd.f32 %v1598_v42, %v1597_v60  ;;  %v2499_v40 = vld [vmem:[%s3588_s1 + $0x30] sm:$0xff] }
 0x43b   :  { %v2478_v22 = vpop.eup %2477  ;;  %v1632_v58 = vmul.f32 %v2476_v49, %v3281_v6 }
 0x43c   :  { %1661 = vperm.xlu1 %2300, %v1627_v56   ;;  %1671 = vperm.xlu0 %2299, %v1629_v15   ;;  %v1630_v34 = vmul.f32 %v2478_v22, %v3421_v38  ;;  %v2480_v25 = vpop.eup %2479  ;;  %v1605_v9 = vrot.slane %v1604_v27, 1  ;;  %2489 = vrcp.f32 %v1599_v5 }
 0x43d   :  { %v1631_v26 = vmul.f32 %v2480_v25, %v3355_v52  ;;  %v2482_v62 = vpop.eup %2481 }
 0x43e   :  { %v1634_v10 = vmul.f32 %v2482_v62, %v3396_v47  ;;  %v1606_v38 = vadd.f32 %v1605_v9, %v1604_v27 }
 0x440   :  { %1686 = vperm.xlu1 %2300, %v1632_v58   ;;  %1676 = vperm.xlu0 %2299, %v1630_v34   ;;  %2491 = vrcp.f32 %v1606_v38 }
 0x441   :  { %v2484_v20 = vpop.eup %2483 }
 0x442   :  { %v1633_v6 = vmul.f32 %v2484_v20, %v3435_v55  ;;  %v2486_v53 = vpop.eup %2485  ;;  %v2493_v55 = vld [vmem:[%s3588_s1 + $0x8] sm:$0xff] }
 0x443   :  { %v1636_v46 = vmul.f32 %v2486_v53, %v3444_v37  ;;  %v2488_v19 = vpop.eup %2487 }
 0x444   :  { %1681 = vperm.xlu1 %2300, %v1631_v26   ;;  %v1635_v52 = vmul.f32 %v2488_v19, %v3463_v8  ;;  %v2494_v8 = vld [vmem:[%s3588_s1] sm:$0xff]  ;;  %v2501_v19 = vld [vmem:[%s3588_s1 + $0x48] sm:$0xff] }
 0x448   :  { %1696 = vperm.xlu1 %2300, %v1634_v10   ;;  %v2500_v10 = vld [vmem:[%s3588_s1 + $0x38] sm:$0xff] }
 0x449   :  { %v2490_v36 = vpop.eup %2489 }
 0x44a   :  { %v1637_v16 = vmul.f32 %v2490_v36, %v3482_v51 }
 0x44c   :  { %1691 = vperm.xlu1 %2300, %v1633_v6  }
 0x44d   :  { %v2492_v47 = vpop.eup %2491 }
 0x44e   :  { %v1638_v32 = vmul.f32 %v2492_v47, %v3486_v48 }
 0x450   :  { %1706 = vperm.xlu1 %2300, %v1636_v46  }
 0x454   :  { %1701 = vperm.xlu1 %2300, %v1635_v52  }
 0x458   :  { %1711 = vperm.xlu1 %2300, %v1637_v16  }
 0x45c   :  { %1716 = vperm.xlu1 %2300, %v1638_v32  }
 0x4a8   :  { %v1647_v41 = vpop.permute.xlu0 %1646 }
 0x4a9   :  { %v1720_v30 = vmul.f32 %v2493_v55, %v1647_v41  ;;  %v1642_v37 = vpop.permute.xlu1 %1641 }
 0x4aa   :  { %v1719_v35 = vmul.f32 %v2494_v8, %v1642_v37 }
 0x4ab   :  { %v1742_v61 = vsel %vm550_vm2, %v1720_v30, 0.0 }
 0x4ac   :  { %v1743_v51 = vrot.slane %v1742_v61, 4  ;;  %v1735_v31 = vsel %vm550_vm2, %v1719_v35, 0.0  ;;  %v2502_v35 = vld [vmem:[%s3588_s1 + $0x40] sm:$0xff] }
 0x4ad   :  { %v1736_v59 = vrot.slane %v1735_v31, 4 }
 0x4ae   :  { %v1744_v23 = vadd.f32 %v1743_v51, %v1742_v61 }
 0x4af   :  { %v1737_v63 = vadd.f32 %v1736_v59, %v1735_v31  ;;  %v1657_v50 = vpop.permute.xlu1 %1656 }
 0x4b0   :  { %v1722_v24 = vmul.f32 %v2495_v44, %v1657_v50  ;;  %v1745_v29 = vrot.slane %v1744_v23, 2 }
 0x4b1   :  { %v1738_v11 = vrot.slane %v1737_v63, 2 }
 0x4b2   :  { %v1756_v14 = vsel %vm550_vm2, %v1722_v24, 0.0  ;;  %v1667_v48 = vpop.permute.xlu0 %1666  ;;  %v1746_v1 = vadd.f32 %v1745_v29, %v1744_v23 }
 0x4b3   :  { %v1757_v45 = vrot.slane %v1756_v14, 4  ;;  %v1652_v54 = vpop.permute.xlu1 %1651  ;;  %v1724_v17 = vmul.f32 %v2496_v12, %v1667_v48  ;;  %v1739_v57 = vadd.f32 %v1738_v11, %v1737_v63  ;;  %v2503_v12 = vld [vmem:[%s3588_s1 + $0x58] sm:$0xff] }
 0x4b4   :  { %v1721_v0 = vmul.f32 %v2497_v33, %v1652_v54  ;;  %v1747_v58 = vrot.slane %v1746_v1, 1 }
 0x4b5   :  { %v1758_v39 = vadd.f32 %v1757_v45, %v1756_v14  ;;  %v1770_v7 = vsel %vm550_vm2, %v1724_v17, 0.0  ;;  %v1740_v22 = vrot.slane %v1739_v57, 1 }
 0x4b6   :  { %v1749_v18 = vsel %vm550_vm2, %v1721_v0, 0.0  ;;  %v1771_v13 = vrot.slane %v1770_v7, 4  ;;  %v1748_v16 = vadd.f32 %v1747_v58, %v1746_v1 }
 0x4b7   :  { %v1750_v28 = vrot.slane %v1749_v18, 4  ;;  %v1662_v4 = vpop.permute.xlu1 %1661  ;;  %v1672_v56 = vpop.permute.xlu0 %1671  ;;  %v1759_v2 = vrot.slane %v1758_v39, 2  ;;  %v1741_v46 = vadd.f32 %v1740_v22, %v1739_v57 }
 0x4b8   :  { %v1772_v21 = vadd.f32 %v1771_v13, %v1770_v7  ;;  %v1723_v49 = vmul.f32 %v2498_v3, %v1662_v4  ;;  %v1725_v15 = vmul.f32 %v2499_v40, %v1672_v56 }
 0x4b9   :  { %v1751_v60 = vadd.f32 %v1750_v28, %v1749_v18  ;;  %v1760_v9 = vadd.f32 %v1759_v2, %v1758_v39  ;;  %v1864_v63 = vsel %vm1863_vm13, %v1748_v16, %v1741_v46  ;;  %v2504_v2 = vld [vmem:[%s3588_s1 + $0x50] sm:$0xff] }
 0x4ba   :  { %v1763_v34 = vsel %vm550_vm2, %v1723_v49, 0.0  ;;  %v1777_v43 = vsel %vm550_vm2, %v1725_v15, 0.0  ;;  %v1773_v62 = vrot.slane %v1772_v21, 2 }
 0x4bb   :  { %v1752_v42 = vrot.slane %v1751_v60, 2  ;;  %v1764_v27 = vrot.slane %v1763_v34, 4  ;;  %v1778_v25 = vrot.slane %v1777_v43, 4  ;;  %v1687_v26 = vpop.permute.xlu1 %1686  ;;  %v1677_v5 = vpop.permute.xlu0 %1676  ;;  %v1761_v30 = vrot.slane %v1760_v9, 1 }
 0x4bc   :  { %v1726_v38 = vmul.f32 %v2500_v10, %v1677_v5  ;;  %v1728_v52 = vmul.f32 %v2501_v19, %v1687_v26  ;;  %v1774_v37 = vadd.f32 %v1773_v62, %v1772_v21 }
 0x4bd   :  { %v1753_v20 = vadd.f32 %v1752_v42, %v1751_v60  ;;  %v1765_v6 = vadd.f32 %v1764_v27, %v1763_v34  ;;  %v1779_v53 = vadd.f32 %v1778_v25, %v1777_v43  ;;  %v1762_v29 = vadd.f32 %v1761_v30, %v1760_v9  ;;  %v2505_v42 = vld [vmem:[%s3588_s1 + $0x68] sm:$0xff]  ;;  %v2507_v30 = vld [vmem:[%s3588_s1 + $0x70] sm:$0xff] }
 0x4be   :  { %v1784_v36 = vsel %vm550_vm2, %v1726_v38, 0.0  ;;  %v1798_v23 = vsel %vm550_vm2, %v1728_v52, 0.0  ;;  %v1775_v45 = vrot.slane %v1774_v37, 1 }
 0x4bf   :  { %v1754_v47 = vrot.slane %v1753_v20, 1  ;;  %v1766_v32 = vrot.slane %v1765_v6, 2  ;;  %v1780_v41 = vrot.slane %v1779_v53, 2  ;;  %v1682_v55 = vpop.permute.xlu1 %1681  ;;  %v1785_v8 = vrot.slane %v1784_v36, 4 }
 0x4c0   :  { %v1727_v61 = vmul.f32 %v2502_v35, %v1682_v55  ;;  %v1799_v0 = vrot.slane %v1798_v23, 4  ;;  %v1776_v4 = vadd.f32 %v1775_v45, %v1774_v37 }
 0x4c1   :  { %v1755_v51 = vadd.f32 %v1754_v47, %v1753_v20  ;;  %v1767_v31 = vadd.f32 %v1766_v32, %v1765_v6  ;;  %v1781_v59 = vadd.f32 %v1780_v41, %v1779_v53  ;;  %v1786_v50 = vadd.f32 %v1785_v8, %v1784_v36  ;;  %v2506_v53 = vld [vmem:[%s3588_s1 + $0x60] sm:$0xff] }
 0x4c2   :  { %v1791_v44 = vsel %vm550_vm2, %v1727_v61, 0.0  ;;  %v1800_v3 = vadd.f32 %v1799_v0, %v1798_v23 }
 0x4c3   :  { %v1866_v24 = vsel %vm1865_vm14, %v1755_v51, %v1864_v63  ;;  %v1768_v11 = vrot.slane %v1767_v31, 1  ;;  %v1782_v14 = vrot.slane %v1781_v59, 1  ;;  %v1697_v48 = vpop.permute.xlu1 %1696  ;;  %v1787_v54 = vrot.slane %v1786_v50, 2 }
 0x4c4   :  { %v1730_v17 = vmul.f32 %v2503_v12, %v1697_v48  ;;  %v1792_v39 = vrot.slane %v1791_v44, 4  ;;  %v1868_v7 = vsel %vm1867_vm15, %v1762_v29, %v1866_v24  ;;  %v1801_v9 = vrot.slane %v1800_v3, 2  ;;  %v2508_v24 = vld [vmem:[%s3588_s1 + $0x78] sm:$0xff]  ;;  %s2535_s1 = smov [#allocation3]  }
 0x4c5   :  { %v1769_v33 = vadd.f32 %v1768_v11, %v1767_v31  ;;  %v1788_v57 = vadd.f32 %v1787_v54, %v1786_v50  ;;  %v1783_v13 = vadd.f32 %v1782_v14, %v1781_v59  ;;  %s2055_s26 = sshll.u32 %s2535_s1, 4  ;;  %s2056_s26 = int_to_ptr.vmem [resolvable:$true] %s2055_s26 }
 0x4c6   :  { %v1812_v1 = vsel %vm550_vm2, %v1730_v17, 0.0  ;;  %v1793_v49 = vadd.f32 %v1792_v39, %v1791_v44  ;;  %v1802_v52 = vadd.f32 %v1801_v9, %v1800_v3  ;;  %s2509_s27 = scalar_lea.vmem %s2056_s26, 256  ;;  %p2514_p1 = scmp.lt.s32.totalorder %s2056_s26, %s2056_s26 }
 0x4c7   :  { %v1870_v18 = vsel %vm1869_vm4, %v1769_v33, %v1868_v7  ;;  %v1692_v28 = vpop.permute.xlu1 %1691  ;;  %v1789_v56 = vrot.slane %v1788_v57, 1  ;;  %v1813_v15 = vrot.slane %v1812_v1, 4  ;;  %p2510_p0 = scmp.ne.s32.totalorder %s2056_s26, %s2509_s27  ;;  %p2515_p2 = scmp.lt.s32.totalorder %s2509_s27, %s2509_s27 }
 0x4c8   :  { %v1729_v21 = vmul.f32 %v2504_v2, %v1692_v28  ;;  %v1872_v22 = vsel %vm1871_vm5, %v1776_v4, %v1870_v18  ;;  %v1794_v26 = vrot.slane %v1793_v49, 2  ;;  %v1803_v61 = vrot.slane %v1802_v52, 1 }
 0x4c9   :  { %v1790_v40 = vadd.f32 %v1789_v56, %v1788_v57  ;;  %v1874_v58 = vsel %vm1873_vm8, %v1783_v13, %v1872_v22  ;;  %v1814_v62 = vadd.f32 %v1813_v15, %v1812_v1  ;;  %p2516_p3 = por %p2515_p2, %p2514_p1 }
 0x4ca   :  { %v1805_v60 = vsel %vm550_vm2, %v1729_v21, 0.0  ;;  %v1795_v19 = vadd.f32 %v1794_v26, %v1793_v49  ;;  %v1804_v45 = vadd.f32 %v1803_v61, %v1802_v52 }
 0x4cb   :  { %v1806_v34 = vrot.slane %v1805_v60, 4  ;;  %v1707_v43 = vpop.permute.xlu1 %1706  ;;  %v1876_v25 = vsel %vm1875_vm12, %v1790_v40, %v1874_v58  ;;  %v1815_v36 = vrot.slane %v1814_v62, 2  ;;  %p2517_p4 = pnand %p2516_p3, %p2510_p0 }
 0x4cc   :  { %v1732_v27 = vmul.f32 %v2505_v42, %v1707_v43  ;;  %1886 = vst.msk [vmem:[#allocation3] sm:$0xff] %vm550_vm2, %v1876_v25  ;;  %v1796_v8 = vrot.slane %v1795_v19, 1 }
 0x4cd   :  { %v1807_v5 = vadd.f32 %v1806_v34, %v1805_v60  ;;  %v1816_v51 = vadd.f32 %v1815_v36, %v1814_v62 }
 0x4ce   :  { %v1826_v10 = vsel %vm550_vm2, %v1732_v27, 0.0  ;;  %v1797_v14 = vadd.f32 %v1796_v8, %v1795_v19 }
 0x4cf   :  { %v1808_v38 = vrot.slane %v1807_v5, 2  ;;  %v1827_v20 = vrot.slane %v1826_v10, 4  ;;  %v1702_v6 = vpop.permute.xlu1 %1701  ;;  %v1817_v54 = vrot.slane %v1816_v51, 1 }
 0x4d0   :  { %v1731_v46 = vmul.f32 %v2506_v53, %v1702_v6  ;;  %v1877_v57 = vsel %vm1863_vm13, %v1804_v45, %v1797_v14 }
 0x4d1   :  { %v1809_v16 = vadd.f32 %v1808_v38, %v1807_v5  ;;  %v1828_v32 = vadd.f32 %v1827_v20, %v1826_v10  ;;  %v1818_v4 = vadd.f32 %v1817_v54, %v1816_v51 }
 0x4d2   :  { %v1819_v47 = vsel %vm550_vm2, %v1731_v46, 0.0 }
 0x4d3   :  { %v1820_v41 = vrot.slane %v1819_v47, 4  ;;  %v1712_v55 = vpop.permute.xlu1 %1711  ;;  %v1810_v31 = vrot.slane %v1809_v16, 1  ;;  %v1829_v63 = vrot.slane %v1828_v32, 2 }
 0x4d4   :  { %v1733_v37 = vmul.f32 %v2507_v30, %v1712_v55 }
 0x4d5   :  { %v1821_v35 = vadd.f32 %v1820_v41, %v1819_v47  ;;  %v1811_v12 = vadd.f32 %v1810_v31, %v1809_v16  ;;  %v1830_v33 = vadd.f32 %v1829_v63, %v1828_v32 }
 0x4d6   :  { %v1833_v59 = vsel %vm550_vm2, %v1733_v37, 0.0 }
 0x4d7   :  { %v1822_v23 = vrot.slane %v1821_v35, 2  ;;  %v1834_v50 = vrot.slane %v1833_v59, 4  ;;  %v1717_v44 = vpop.permute.xlu1 %1716  ;;  %v1878_v1 = vsel %vm1865_vm14, %v1811_v12, %v1877_v57  ;;  %v1831_v56 = vrot.slane %v1830_v33, 1 }
 0x4d8   :  { %v1734_v11 = vmul.f32 %v2508_v24, %v1717_v44  ;;  %v1879_v3 = vsel %vm1867_vm15, %v1818_v4, %v1878_v1 }
 0x4d9   :  { %v1823_v48 = vadd.f32 %v1822_v23, %v1821_v35  ;;  %v1835_v29 = vadd.f32 %v1834_v50, %v1833_v59  ;;  %v1832_v60 = vadd.f32 %v1831_v56, %v1830_v33 }
 0x4da   :  { %v1840_v17 = vsel %vm550_vm2, %v1734_v11, 0.0 }
 0x4db   :  { %v1824_v0 = vrot.slane %v1823_v48, 1  ;;  %v1836_v39 = vrot.slane %v1835_v29, 2  ;;  %v1841_v7 = vrot.slane %v1840_v17, 4 }
 0x4dd   :  { %v1837_v18 = vadd.f32 %v1836_v39, %v1835_v29  ;;  %v1842_v13 = vadd.f32 %v1841_v7, %v1840_v17  ;;  %v1825_v28 = vadd.f32 %v1824_v0, %v1823_v48 }
 0x4df   :  { %v1838_v2 = vrot.slane %v1837_v18, 1  ;;  %v1843_v21 = vrot.slane %v1842_v13, 2  ;;  %v1880_v40 = vsel %vm1869_vm4, %v1825_v28, %v1879_v3 }
 0x4e0   :  { %v1881_v43 = vsel %vm1871_vm5, %v1832_v60, %v1880_v40 }
 0x4e1   :  { %v1844_v49 = vadd.f32 %v1843_v21, %v1842_v13  ;;  %v1839_v15 = vadd.f32 %v1838_v2, %v1837_v18 }
 0x4e3   :  { %v1845_v22 = vrot.slane %v1844_v49, 1  ;;  %v1882_v58 = vsel %vm1873_vm8, %v1839_v15, %v1881_v43 }
 0x4e5   :  { %v1846_v34 = vadd.f32 %v1845_v22, %v1844_v49 }
 0x4e7   :  { %v1883_v42 = vsel %vm1875_vm12, %v1846_v34, %v1882_v58 }
 0x4e8   :  { %1887 = vst.msk [vmem:[#allocation3 + $0x8] sm:$0xff] %vm550_vm2, %v1883_v42 }
 0x4e9   :  { %2520 = shalt.err (!%p2517_p4)
}
 0x4ea   :  { %s2536_s28 = smov 128   ;;  %s2537_s4 = smov 8  }
 0x4eb   :  { %2061 = dma.vmem_to_hbm [thread:$0]  %s2056_s26, 256, %s3599_s12, [#allocation4], %s2536_s28, %s2536_s28, %s2537_s4  }
 0x4ec   :  { %2529 = dma.done.wait [#allocation4], 256  }
 0x4ed   :  { %2530 = vsyncadd [#allocation4], 4294967040 }
 0x4ee   :  { %2069 = vsyncpa [#allocation4], 1 }

</bundles_post_ra>
